<compile_context>
chip_gen: v7x
topology: tpu7x:2x2x1
jax: 0.10.0
libtpu: 0.0.40
codegen_flags: <defaults>
</compile_context>

<pallas_src>
import functools
from typing import Dict, List, Optional

import jax
import jax.numpy as jnp
from jax import lax
from jax.experimental import pallas as pl
from jax.experimental.pallas import tpu as pltpu

MAX_TOKENS = 16      # fixed sentence capacity -> one compile for all lengths
_LANE = 128
_SUBLANE = 8


def _round_up(x: int, m: int) -> int:
    return (x + m - 1) // m * m


def _classifier_kernel(ids_ref, meta_ref,        # SMEM: (MAX_TOKENS,), (2,)
                       emb_hbm, w_ref, b_ref,    # HBM table, VMEM weights
                       out_ref,                  # VMEM (8, LPAD) output slab
                       rows, sems):              # VMEM scratch, DMA semaphores
    max_t, dpad = rows.shape
    vocab = emb_hbm.shape[0]
    lpad = out_ref.shape[1]

    # ---- DMA-gather only the needed rows HBM -> VMEM (all in flight) -------
    copies = []
    for t in range(max_t):
        idx = jnp.minimum(jnp.maximum(ids_ref[t], 0), vocab - 1)  # clamp OOB
        cp = pltpu.make_async_copy(emb_hbm.at[pl.ds(idx, 1), :],
                                   rows.at[pl.ds(t, 1), :],
                                   sems.at[t])
        cp.start()
        copies.append(cp)
    for cp in copies:
        cp.wait()

    # ---- masked mean pool over the real tokens (one vectorized reduce) -----
    num_tokens = meta_ref[0]
    rows_f = rows[...].astype(jnp.float32)                        # (MAX_T, DPAD)
    t_idx = lax.broadcasted_iota(jnp.int32, (max_t, dpad), 0)
    pooled = jnp.sum(jnp.where(t_idx < num_tokens, rows_f, 0.0),
                     axis=0, keepdims=True)                       # (1, DPAD)
    inv_n = 1.0 / jnp.maximum(num_tokens, 1).astype(jnp.float32)
    pooled = pooled * inv_n

    # ---- classifier: [1, DPAD] @ [DPAD, LPAD] (label dim padded to 128) ----
    logits = jnp.dot(pooled, w_ref[...], preferred_element_type=jnp.float32)
    logits = logits + b_ref[...]                                  # (1, LPAD)

    # ---- log-softmax (padded label lanes carry a -1e30 bias -> ignored) ----
    m = jnp.max(logits, axis=-1, keepdims=True)
    lse = m + jnp.log(jnp.sum(jnp.exp(logits - m), axis=-1, keepdims=True))
    log_probs = logits - lse

    # ---- optional NLL loss (label == -1 means "no label") ------------------
    label = meta_ref[1]
    lane1 = lax.broadcasted_iota(jnp.int32, (1, lpad), 1)
    picked = jnp.sum(jnp.where(lane1 == label, log_probs, 0.0))
    loss = jnp.where(label >= 0, -picked, 0.0)

    # ---- single lane-dense (8, LPAD) output slab ----------------------------
    # row 0: logits, row 1: log_probs, row 2 lane 0: loss, rest zero.
    rid = lax.broadcasted_iota(jnp.int32, (_SUBLANE, lpad), 0)
    lane8 = lax.broadcasted_iota(jnp.int32, (_SUBLANE, lpad), 1)
    logits_b = jnp.broadcast_to(logits, (_SUBLANE, lpad))
    lp_b = jnp.broadcast_to(log_probs, (_SUBLANE, lpad))
    loss_b = jnp.where(lane8 == 0, loss, 0.0)
    slab = jnp.where(rid == 0, logits_b,
                     jnp.where(rid == 1, lp_b,
                               jnp.where(rid == 2, loss_b, 0.0)))
    out_ref[...] = slab


@jax.jit
def _run_kernel(token_ids, meta, emb_pad, w_pad, b_pad):
    dpad = emb_pad.shape[1]
    lpad = w_pad.shape[1]
    smem = pl.BlockSpec(memory_space=pltpu.MemorySpace.SMEM)
    vmem = pl.BlockSpec(memory_space=pltpu.MemorySpace.VMEM)
    return pl.pallas_call(
        _classifier_kernel,
        out_shape=jax.ShapeDtypeStruct((_SUBLANE, lpad), jnp.float32),
        in_specs=[smem,                                  # token ids
                  smem,                                  # [num_tokens, label]
                  pl.BlockSpec(memory_space=pl.ANY),     # embedding stays in HBM
                  vmem,                                  # W (DPAD, LPAD)
                  vmem],                                 # b (1, LPAD)
        out_specs=vmem,
        scratch_shapes=[
            pltpu.VMEM((MAX_TOKENS, dpad), emb_pad.dtype),
            pltpu.SemaphoreType.DMA((MAX_TOKENS,)),
        ],
    )(token_ids, meta, emb_pad, w_pad, b_pad)


class PallasModel:
    """JAX/Pallas analogue of the PyTorch `Model` skeleton."""

    def __init__(self, word_to_idx: Dict[str, int],
                 label_to_idx: Dict[str, int],
                 embedding_dim: int = 100):
        self.word_to_idx = dict(word_to_idx)
        self.label_to_idx = dict(label_to_idx)
        self.embedding_dim = embedding_dim
        vocab_size = len(word_to_idx)
        num_labels = len(label_to_idx)
        self._num_labels = num_labels

        key = jax.random.PRNGKey(0)
        k_emb, k_w, k_b = jax.random.split(key, 3)
        self.embedding = (jax.random.normal(k_emb, (vocab_size, embedding_dim),
                                            jnp.float32) * 0.1)
        self.w = (jax.random.normal(k_w, (embedding_dim, num_labels),
                                    jnp.float32) * 0.1)
        self.b = jax.random.normal(k_b, (1, num_labels), jnp.float32) * 0.01

        # Kernel-side padded copies (lane-dense D and L).  Padded label lanes
        # get a -1e30 bias so the in-kernel log-softmax ignores them.
        dpad = _round_up(embedding_dim, _LANE)
        lpad = _round_up(num_labels, _LANE)
        self._emb_pad = (jnp.zeros((vocab_size, dpad), jnp.float32)
                         .at[:, :embedding_dim].set(self.embedding))
        self._w_pad = (jnp.zeros((dpad, lpad), jnp.float32)
                       .at[:embedding_dim, :num_labels].set(self.w))
        self._b_pad = (jnp.full((1, lpad), -1e30, jnp.float32)
                       .at[:, :num_labels].set(self.b))

    def forward(self, tokens: List[str],
                label: Optional[str] = None) -> Dict[str, jnp.ndarray]:
        # glue: string -> index lookup stays in plain Python
        ids = [self.word_to_idx.get(t, 0) for t in tokens][:MAX_TOKENS]
        num_tokens = len(ids)
        ids = ids + [0] * (MAX_TOKENS - num_tokens)   # fixed shape -> one compile
        token_ids = jnp.asarray(ids, dtype=jnp.int32)
        label_idx = self.label_to_idx[label] if label is not None else -1
        meta = jnp.asarray([num_tokens, label_idx], dtype=jnp.int32)

        out = _run_kernel(token_ids, meta,
                          self._emb_pad, self._w_pad, self._b_pad)
        L = self._num_labels
        logits = out[0, :L]
        log_probs = out[1, :L]
        result = {"logits": logits, "log_probs": log_probs,
                  "probs": jnp.exp(log_probs)}
        if label is not None:
            result["loss"] = out[2, 0]
        return result


if __name__ == "__main__":
    # Small deterministic setup: vocab=16, embedding_dim=128, 4 labels, 8 tokens.
    vocab = [f"w{i}" for i in range(16)]
    word_to_idx = {w: i for i, w in enumerate(vocab)}
    labels = ["pos", "neg", "neutral", "other"]
    label_to_idx = {l: i for i, l in enumerate(labels)}

    model = PallasModel(word_to_idx, label_to_idx, embedding_dim=128)

    tokens = ["w1", "w3", "w5", "w7", "w2", "w4", "w6", "w8"]
    out = model.forward(tokens, label="pos")
    jax.block_until_ready(out["logits"])
    jax.block_until_ready(out["loss"])

    # quick sanity check against a plain-JAX reference
    ids = jnp.asarray([word_to_idx[t] for t in tokens], dtype=jnp.int32)
    pooled_ref = jnp.mean(model.embedding[ids], axis=0, keepdims=True)
    logits_ref = pooled_ref @ model.w + model.b
    lp_ref = logits_ref - jax.scipy.special.logsumexp(logits_ref, axis=-1,
                                                      keepdims=True)
    assert jnp.allclose(out["logits"], logits_ref[0], atol=1e-4)
    assert jnp.allclose(out["log_probs"], lp_ref[0], atol=1e-4)
    assert jnp.allclose(out["loss"], -lp_ref[0, label_to_idx["pos"]], atol=1e-4)

    # also exercise the label=None path and a different (shorter) length:
    # same compiled kernel is reused thanks to the fixed MAX_TOKENS padding.
    out2 = model.forward(tokens[:5], label=None)
    jax.block_until_ready(out2["logits"])
    pooled_ref2 = jnp.mean(model.embedding[ids[:5]], axis=0, keepdims=True)
    logits_ref2 = pooled_ref2 @ model.w + model.b
    assert jnp.allclose(out2["logits"], logits_ref2[0], atol=1e-4)

    print("KERNEL_OK")
</pallas_src>

<mosaic_0001>
module attributes {stable_mosaic.version = 11 : i64} {
  func.func @_classifier_kernel(%arg0: memref<16xi32, #tpu.memory_space<smem>>, %arg1: memref<2xi32, #tpu.memory_space<smem>>, %arg2: memref<16x128xf32, #tpu.memory_space<any>>, %arg3: memref<128x128xf32, #tpu.memory_space<vmem>>, %arg4: memref<1x128xf32, #tpu.memory_space<vmem>>, %arg5: memref<8x128xf32, #tpu.memory_space<vmem>>, %arg6: memref<16x128xf32, #tpu.memory_space<vmem>>, %arg7: memref<16x!tpu.dma_semaphore, #tpu.memory_space<semaphore_mem>>) attributes {dimension_semantics = [], scalar_prefetch = 0 : i64, scratch_operands = 2 : i64, tpu.core_type = #tpu.core_type<tc>} {
    %c0 = arith.constant 0 : index
    %0 = memref.load %arg0[%c0] : memref<16xi32, #tpu.memory_space<smem>>
    %c0_i32 = arith.constant 0 : i32
    %1 = arith.maxsi %0, %c0_i32 : i32
    %c15_i32 = arith.constant 15 : i32
    %2 = arith.minsi %1, %c15_i32 : i32
    %c0_i32_0 = arith.constant 0 : i32
    %c0_i32_1 = arith.constant 0 : i32
    %3 = tpu.memref_slice %arg2[%2, %c0_i32_1] : memref<16x128xf32, #tpu.memory_space<any>> -> memref<1x128xf32, #tpu.memory_space<any>>
    %c0_i32_2 = arith.constant 0 : i32
    %c0_i32_3 = arith.constant 0 : i32
    %4 = tpu.memref_slice %arg6[%c0_i32_2, %c0_i32_3] : memref<16x128xf32, #tpu.memory_space<vmem>> -> memref<1x128xf32, #tpu.memory_space<vmem>>
    %5 = tpu.memref_slice %arg7[%c0_i32_0] : memref<16x!tpu.dma_semaphore, #tpu.memory_space<semaphore_mem>> -> memref<1x!tpu.dma_semaphore, #tpu.memory_space<semaphore_mem>>
    %6 = tpu.memref_squeeze %5 : memref<1x!tpu.dma_semaphore, #tpu.memory_space<semaphore_mem>> -> memref<!tpu.dma_semaphore, #tpu.memory_space<semaphore_mem>>
    tpu.enqueue_dma source(%3 : memref<1x128xf32, #tpu.memory_space<any>>) target(%4 : memref<1x128xf32, #tpu.memory_space<vmem>>) target_semaphore(%6 : memref<!tpu.dma_semaphore, #tpu.memory_space<semaphore_mem>>)
    %c1 = arith.constant 1 : index
    %7 = memref.load %arg0[%c1] : memref<16xi32, #tpu.memory_space<smem>>
    %c0_i32_4 = arith.constant 0 : i32
    %8 = arith.maxsi %7, %c0_i32_4 : i32
    %c15_i32_5 = arith.constant 15 : i32
    %9 = arith.minsi %8, %c15_i32_5 : i32
    %c1_i32 = arith.constant 1 : i32
    %c0_i32_6 = arith.constant 0 : i32
    %10 = tpu.memref_slice %arg2[%9, %c0_i32_6] : memref<16x128xf32, #tpu.memory_space<any>> -> memref<1x128xf32, #tpu.memory_space<any>>
    %c1_i32_7 = arith.constant 1 : i32
    %c0_i32_8 = arith.constant 0 : i32
    %11 = tpu.memref_slice %arg6[%c1_i32_7, %c0_i32_8] : memref<16x128xf32, #tpu.memory_space<vmem>> -> memref<1x128xf32, #tpu.memory_space<vmem>>
    %12 = tpu.memref_slice %arg7[%c1_i32] : memref<16x!tpu.dma_semaphore, #tpu.memory_space<semaphore_mem>> -> memref<1x!tpu.dma_semaphore, #tpu.memory_space<semaphore_mem>>
    %13 = tpu.memref_squeeze %12 : memref<1x!tpu.dma_semaphore, #tpu.memory_space<semaphore_mem>> -> memref<!tpu.dma_semaphore, #tpu.memory_space<semaphore_mem>>
    tpu.enqueue_dma source(%10 : memref<1x128xf32, #tpu.memory_space<any>>) target(%11 : memref<1x128xf32, #tpu.memory_space<vmem>>) target_semaphore(%13 : memref<!tpu.dma_semaphore, #tpu.memory_space<semaphore_mem>>)
    %c2 = arith.constant 2 : index
    %14 = memref.load %arg0[%c2] : memref<16xi32, #tpu.memory_space<smem>>
    %c0_i32_9 = arith.constant 0 : i32
    %15 = arith.maxsi %14, %c0_i32_9 : i32
    %c15_i32_10 = arith.constant 15 : i32
    %16 = arith.minsi %15, %c15_i32_10 : i32
    %c2_i32 = arith.constant 2 : i32
    %c0_i32_11 = arith.constant 0 : i32
    %17 = tpu.memref_slice %arg2[%16, %c0_i32_11] : memref<16x128xf32, #tpu.memory_space<any>> -> memref<1x128xf32, #tpu.memory_space<any>>
    %c2_i32_12 = arith.constant 2 : i32
    %c0_i32_13 = arith.constant 0 : i32
    %18 = tpu.memref_slice %arg6[%c2_i32_12, %c0_i32_13] : memref<16x128xf32, #tpu.memory_space<vmem>> -> memref<1x128xf32, #tpu.memory_space<vmem>>
    %19 = tpu.memref_slice %arg7[%c2_i32] : memref<16x!tpu.dma_semaphore, #tpu.memory_space<semaphore_mem>> -> memref<1x!tpu.dma_semaphore, #tpu.memory_space<semaphore_mem>>
    %20 = tpu.memref_squeeze %19 : memref<1x!tpu.dma_semaphore, #tpu.memory_space<semaphore_mem>> -> memref<!tpu.dma_semaphore, #tpu.memory_space<semaphore_mem>>
    tpu.enqueue_dma source(%17 : memref<1x128xf32, #tpu.memory_space<any>>) target(%18 : memref<1x128xf32, #tpu.memory_space<vmem>>) target_semaphore(%20 : memref<!tpu.dma_semaphore, #tpu.memory_space<semaphore_mem>>)
    %c3 = arith.constant 3 : index
    %21 = memref.load %arg0[%c3] : memref<16xi32, #tpu.memory_space<smem>>
    %c0_i32_14 = arith.constant 0 : i32
    %22 = arith.maxsi %21, %c0_i32_14 : i32
    %c15_i32_15 = arith.constant 15 : i32
    %23 = arith.minsi %22, %c15_i32_15 : i32
    %c3_i32 = arith.constant 3 : i32
    %c0_i32_16 = arith.constant 0 : i32
    %24 = tpu.memref_slice %arg2[%23, %c0_i32_16] : memref<16x128xf32, #tpu.memory_space<any>> -> memref<1x128xf32, #tpu.memory_space<any>>
    %c3_i32_17 = arith.constant 3 : i32
    %c0_i32_18 = arith.constant 0 : i32
    %25 = tpu.memref_slice %arg6[%c3_i32_17, %c0_i32_18] : memref<16x128xf32, #tpu.memory_space<vmem>> -> memref<1x128xf32, #tpu.memory_space<vmem>>
    %26 = tpu.memref_slice %arg7[%c3_i32] : memref<16x!tpu.dma_semaphore, #tpu.memory_space<semaphore_mem>> -> memref<1x!tpu.dma_semaphore, #tpu.memory_space<semaphore_mem>>
    %27 = tpu.memref_squeeze %26 : memref<1x!tpu.dma_semaphore, #tpu.memory_space<semaphore_mem>> -> memref<!tpu.dma_semaphore, #tpu.memory_space<semaphore_mem>>
    tpu.enqueue_dma source(%24 : memref<1x128xf32, #tpu.memory_space<any>>) target(%25 : memref<1x128xf32, #tpu.memory_space<vmem>>) target_semaphore(%27 : memref<!tpu.dma_semaphore, #tpu.memory_space<semaphore_mem>>)
    %c4 = arith.constant 4 : index
    %28 = memref.load %arg0[%c4] : memref<16xi32, #tpu.memory_space<smem>>
    %c0_i32_19 = arith.constant 0 : i32
    %29 = arith.maxsi %28, %c0_i32_19 : i32
    %c15_i32_20 = arith.constant 15 : i32
    %30 = arith.minsi %29, %c15_i32_20 : i32
    %c4_i32 = arith.constant 4 : i32
    %c0_i32_21 = arith.constant 0 : i32
    %31 = tpu.memref_slice %arg2[%30, %c0_i32_21] : memref<16x128xf32, #tpu.memory_space<any>> -> memref<1x128xf32, #tpu.memory_space<any>>
    %c4_i32_22 = arith.constant 4 : i32
    %c0_i32_23 = arith.constant 0 : i32
    %32 = tpu.memref_slice %arg6[%c4_i32_22, %c0_i32_23] : memref<16x128xf32, #tpu.memory_space<vmem>> -> memref<1x128xf32, #tpu.memory_space<vmem>>
    %33 = tpu.memref_slice %arg7[%c4_i32] : memref<16x!tpu.dma_semaphore, #tpu.memory_space<semaphore_mem>> -> memref<1x!tpu.dma_semaphore, #tpu.memory_space<semaphore_mem>>
    %34 = tpu.memref_squeeze %33 : memref<1x!tpu.dma_semaphore, #tpu.memory_space<semaphore_mem>> -> memref<!tpu.dma_semaphore, #tpu.memory_space<semaphore_mem>>
    tpu.enqueue_dma source(%31 : memref<1x128xf32, #tpu.memory_space<any>>) target(%32 : memref<1x128xf32, #tpu.memory_space<vmem>>) target_semaphore(%34 : memref<!tpu.dma_semaphore, #tpu.memory_space<semaphore_mem>>)
    %c5 = arith.constant 5 : index
    %35 = memref.load %arg0[%c5] : memref<16xi32, #tpu.memory_space<smem>>
    %c0_i32_24 = arith.constant 0 : i32
    %36 = arith.maxsi %35, %c0_i32_24 : i32
    %c15_i32_25 = arith.constant 15 : i32
    %37 = arith.minsi %36, %c15_i32_25 : i32
    %c5_i32 = arith.constant 5 : i32
    %c0_i32_26 = arith.constant 0 : i32
    %38 = tpu.memref_slice %arg2[%37, %c0_i32_26] : memref<16x128xf32, #tpu.memory_space<any>> -> memref<1x128xf32, #tpu.memory_space<any>>
    %c5_i32_27 = arith.constant 5 : i32
    %c0_i32_28 = arith.constant 0 : i32
    %39 = tpu.memref_slice %arg6[%c5_i32_27, %c0_i32_28] : memref<16x128xf32, #tpu.memory_space<vmem>> -> memref<1x128xf32, #tpu.memory_space<vmem>>
    %40 = tpu.memref_slice %arg7[%c5_i32] : memref<16x!tpu.dma_semaphore, #tpu.memory_space<semaphore_mem>> -> memref<1x!tpu.dma_semaphore, #tpu.memory_space<semaphore_mem>>
    %41 = tpu.memref_squeeze %40 : memref<1x!tpu.dma_semaphore, #tpu.memory_space<semaphore_mem>> -> memref<!tpu.dma_semaphore, #tpu.memory_space<semaphore_mem>>
    tpu.enqueue_dma source(%38 : memref<1x128xf32, #tpu.memory_space<any>>) target(%39 : memref<1x128xf32, #tpu.memory_space<vmem>>) target_semaphore(%41 : memref<!tpu.dma_semaphore, #tpu.memory_space<semaphore_mem>>)
    %c6 = arith.constant 6 : index
    %42 = memref.load %arg0[%c6] : memref<16xi32, #tpu.memory_space<smem>>
    %c0_i32_29 = arith.constant 0 : i32
    %43 = arith.maxsi %42, %c0_i32_29 : i32
    %c15_i32_30 = arith.constant 15 : i32
    %44 = arith.minsi %43, %c15_i32_30 : i32
    %c6_i32 = arith.constant 6 : i32
    %c0_i32_31 = arith.constant 0 : i32
    %45 = tpu.memref_slice %arg2[%44, %c0_i32_31] : memref<16x128xf32, #tpu.memory_space<any>> -> memref<1x128xf32, #tpu.memory_space<any>>
    %c6_i32_32 = arith.constant 6 : i32
    %c0_i32_33 = arith.constant 0 : i32
    %46 = tpu.memref_slice %arg6[%c6_i32_32, %c0_i32_33] : memref<16x128xf32, #tpu.memory_space<vmem>> -> memref<1x128xf32, #tpu.memory_space<vmem>>
    %47 = tpu.memref_slice %arg7[%c6_i32] : memref<16x!tpu.dma_semaphore, #tpu.memory_space<semaphore_mem>> -> memref<1x!tpu.dma_semaphore, #tpu.memory_space<semaphore_mem>>
    %48 = tpu.memref_squeeze %47 : memref<1x!tpu.dma_semaphore, #tpu.memory_space<semaphore_mem>> -> memref<!tpu.dma_semaphore, #tpu.memory_space<semaphore_mem>>
    tpu.enqueue_dma source(%45 : memref<1x128xf32, #tpu.memory_space<any>>) target(%46 : memref<1x128xf32, #tpu.memory_space<vmem>>) target_semaphore(%48 : memref<!tpu.dma_semaphore, #tpu.memory_space<semaphore_mem>>)
    %c7 = arith.constant 7 : index
    %49 = memref.load %arg0[%c7] : memref<16xi32, #tpu.memory_space<smem>>
    %c0_i32_34 = arith.constant 0 : i32
    %50 = arith.maxsi %49, %c0_i32_34 : i32
    %c15_i32_35 = arith.constant 15 : i32
    %51 = arith.minsi %50, %c15_i32_35 : i32
    %c7_i32 = arith.constant 7 : i32
    %c0_i32_36 = arith.constant 0 : i32
    %52 = tpu.memref_slice %arg2[%51, %c0_i32_36] : memref<16x128xf32, #tpu.memory_space<any>> -> memref<1x128xf32, #tpu.memory_space<any>>
    %c7_i32_37 = arith.constant 7 : i32
    %c0_i32_38 = arith.constant 0 : i32
    %53 = tpu.memref_slice %arg6[%c7_i32_37, %c0_i32_38] : memref<16x128xf32, #tpu.memory_space<vmem>> -> memref<1x128xf32, #tpu.memory_space<vmem>>
    %54 = tpu.memref_slice %arg7[%c7_i32] : memref<16x!tpu.dma_semaphore, #tpu.memory_space<semaphore_mem>> -> memref<1x!tpu.dma_semaphore, #tpu.memory_space<semaphore_mem>>
    %55 = tpu.memref_squeeze %54 : memref<1x!tpu.dma_semaphore, #tpu.memory_space<semaphore_mem>> -> memref<!tpu.dma_semaphore, #tpu.memory_space<semaphore_mem>>
    tpu.enqueue_dma source(%52 : memref<1x128xf32, #tpu.memory_space<any>>) target(%53 : memref<1x128xf32, #tpu.memory_space<vmem>>) target_semaphore(%55 : memref<!tpu.dma_semaphore, #tpu.memory_space<semaphore_mem>>)
    %c8 = arith.constant 8 : index
    %56 = memref.load %arg0[%c8] : memref<16xi32, #tpu.memory_space<smem>>
    %c0_i32_39 = arith.constant 0 : i32
    %57 = arith.maxsi %56, %c0_i32_39 : i32
    %c15_i32_40 = arith.constant 15 : i32
    %58 = arith.minsi %57, %c15_i32_40 : i32
    %c8_i32 = arith.constant 8 : i32
    %c0_i32_41 = arith.constant 0 : i32
    %59 = tpu.memref_slice %arg2[%58, %c0_i32_41] : memref<16x128xf32, #tpu.memory_space<any>> -> memref<1x128xf32, #tpu.memory_space<any>>
    %c8_i32_42 = arith.constant 8 : i32
    %c0_i32_43 = arith.constant 0 : i32
    %60 = tpu.memref_slice %arg6[%c8_i32_42, %c0_i32_43] : memref<16x128xf32, #tpu.memory_space<vmem>> -> memref<1x128xf32, #tpu.memory_space<vmem>>
    %61 = tpu.memref_slice %arg7[%c8_i32] : memref<16x!tpu.dma_semaphore, #tpu.memory_space<semaphore_mem>> -> memref<1x!tpu.dma_semaphore, #tpu.memory_space<semaphore_mem>>
    %62 = tpu.memref_squeeze %61 : memref<1x!tpu.dma_semaphore, #tpu.memory_space<semaphore_mem>> -> memref<!tpu.dma_semaphore, #tpu.memory_space<semaphore_mem>>
    tpu.enqueue_dma source(%59 : memref<1x128xf32, #tpu.memory_space<any>>) target(%60 : memref<1x128xf32, #tpu.memory_space<vmem>>) target_semaphore(%62 : memref<!tpu.dma_semaphore, #tpu.memory_space<semaphore_mem>>)
    %c9 = arith.constant 9 : index
    %63 = memref.load %arg0[%c9] : memref<16xi32, #tpu.memory_space<smem>>
    %c0_i32_44 = arith.constant 0 : i32
    %64 = arith.maxsi %63, %c0_i32_44 : i32
    %c15_i32_45 = arith.constant 15 : i32
    %65 = arith.minsi %64, %c15_i32_45 : i32
    %c9_i32 = arith.constant 9 : i32
    %c0_i32_46 = arith.constant 0 : i32
    %66 = tpu.memref_slice %arg2[%65, %c0_i32_46] : memref<16x128xf32, #tpu.memory_space<any>> -> memref<1x128xf32, #tpu.memory_space<any>>
    %c9_i32_47 = arith.constant 9 : i32
    %c0_i32_48 = arith.constant 0 : i32
    %67 = tpu.memref_slice %arg6[%c9_i32_47, %c0_i32_48] : memref<16x128xf32, #tpu.memory_space<vmem>> -> memref<1x128xf32, #tpu.memory_space<vmem>>
    %68 = tpu.memref_slice %arg7[%c9_i32] : memref<16x!tpu.dma_semaphore, #tpu.memory_space<semaphore_mem>> -> memref<1x!tpu.dma_semaphore, #tpu.memory_space<semaphore_mem>>
    %69 = tpu.memref_squeeze %68 : memref<1x!tpu.dma_semaphore, #tpu.memory_space<semaphore_mem>> -> memref<!tpu.dma_semaphore, #tpu.memory_space<semaphore_mem>>
    tpu.enqueue_dma source(%66 : memref<1x128xf32, #tpu.memory_space<any>>) target(%67 : memref<1x128xf32, #tpu.memory_space<vmem>>) target_semaphore(%69 : memref<!tpu.dma_semaphore, #tpu.memory_space<semaphore_mem>>)
    %c10 = arith.constant 10 : index
    %70 = memref.load %arg0[%c10] : memref<16xi32, #tpu.memory_space<smem>>
    %c0_i32_49 = arith.constant 0 : i32
    %71 = arith.maxsi %70, %c0_i32_49 : i32
    %c15_i32_50 = arith.constant 15 : i32
    %72 = arith.minsi %71, %c15_i32_50 : i32
    %c10_i32 = arith.constant 10 : i32
    %c0_i32_51 = arith.constant 0 : i32
    %73 = tpu.memref_slice %arg2[%72, %c0_i32_51] : memref<16x128xf32, #tpu.memory_space<any>> -> memref<1x128xf32, #tpu.memory_space<any>>
    %c10_i32_52 = arith.constant 10 : i32
    %c0_i32_53 = arith.constant 0 : i32
    %74 = tpu.memref_slice %arg6[%c10_i32_52, %c0_i32_53] : memref<16x128xf32, #tpu.memory_space<vmem>> -> memref<1x128xf32, #tpu.memory_space<vmem>>
    %75 = tpu.memref_slice %arg7[%c10_i32] : memref<16x!tpu.dma_semaphore, #tpu.memory_space<semaphore_mem>> -> memref<1x!tpu.dma_semaphore, #tpu.memory_space<semaphore_mem>>
    %76 = tpu.memref_squeeze %75 : memref<1x!tpu.dma_semaphore, #tpu.memory_space<semaphore_mem>> -> memref<!tpu.dma_semaphore, #tpu.memory_space<semaphore_mem>>
    tpu.enqueue_dma source(%73 : memref<1x128xf32, #tpu.memory_space<any>>) target(%74 : memref<1x128xf32, #tpu.memory_space<vmem>>) target_semaphore(%76 : memref<!tpu.dma_semaphore, #tpu.memory_space<semaphore_mem>>)
    %c11 = arith.constant 11 : index
    %77 = memref.load %arg0[%c11] : memref<16xi32, #tpu.memory_space<smem>>
    %c0_i32_54 = arith.constant 0 : i32
    %78 = arith.maxsi %77, %c0_i32_54 : i32
    %c15_i32_55 = arith.constant 15 : i32
    %79 = arith.minsi %78, %c15_i32_55 : i32
    %c11_i32 = arith.constant 11 : i32
    %c0_i32_56 = arith.constant 0 : i32
    %80 = tpu.memref_slice %arg2[%79, %c0_i32_56] : memref<16x128xf32, #tpu.memory_space<any>> -> memref<1x128xf32, #tpu.memory_space<any>>
    %c11_i32_57 = arith.constant 11 : i32
    %c0_i32_58 = arith.constant 0 : i32
    %81 = tpu.memref_slice %arg6[%c11_i32_57, %c0_i32_58] : memref<16x128xf32, #tpu.memory_space<vmem>> -> memref<1x128xf32, #tpu.memory_space<vmem>>
    %82 = tpu.memref_slice %arg7[%c11_i32] : memref<16x!tpu.dma_semaphore, #tpu.memory_space<semaphore_mem>> -> memref<1x!tpu.dma_semaphore, #tpu.memory_space<semaphore_mem>>
    %83 = tpu.memref_squeeze %82 : memref<1x!tpu.dma_semaphore, #tpu.memory_space<semaphore_mem>> -> memref<!tpu.dma_semaphore, #tpu.memory_space<semaphore_mem>>
    tpu.enqueue_dma source(%80 : memref<1x128xf32, #tpu.memory_space<any>>) target(%81 : memref<1x128xf32, #tpu.memory_space<vmem>>) target_semaphore(%83 : memref<!tpu.dma_semaphore, #tpu.memory_space<semaphore_mem>>)
    %c12 = arith.constant 12 : index
    %84 = memref.load %arg0[%c12] : memref<16xi32, #tpu.memory_space<smem>>
    %c0_i32_59 = arith.constant 0 : i32
    %85 = arith.maxsi %84, %c0_i32_59 : i32
    %c15_i32_60 = arith.constant 15 : i32
    %86 = arith.minsi %85, %c15_i32_60 : i32
    %c12_i32 = arith.constant 12 : i32
    %c0_i32_61 = arith.constant 0 : i32
    %87 = tpu.memref_slice %arg2[%86, %c0_i32_61] : memref<16x128xf32, #tpu.memory_space<any>> -> memref<1x128xf32, #tpu.memory_space<any>>
    %c12_i32_62 = arith.constant 12 : i32
    %c0_i32_63 = arith.constant 0 : i32
    %88 = tpu.memref_slice %arg6[%c12_i32_62, %c0_i32_63] : memref<16x128xf32, #tpu.memory_space<vmem>> -> memref<1x128xf32, #tpu.memory_space<vmem>>
    %89 = tpu.memref_slice %arg7[%c12_i32] : memref<16x!tpu.dma_semaphore, #tpu.memory_space<semaphore_mem>> -> memref<1x!tpu.dma_semaphore, #tpu.memory_space<semaphore_mem>>
    %90 = tpu.memref_squeeze %89 : memref<1x!tpu.dma_semaphore, #tpu.memory_space<semaphore_mem>> -> memref<!tpu.dma_semaphore, #tpu.memory_space<semaphore_mem>>
    tpu.enqueue_dma source(%87 : memref<1x128xf32, #tpu.memory_space<any>>) target(%88 : memref<1x128xf32, #tpu.memory_space<vmem>>) target_semaphore(%90 : memref<!tpu.dma_semaphore, #tpu.memory_space<semaphore_mem>>)
    %c13 = arith.constant 13 : index
    %91 = memref.load %arg0[%c13] : memref<16xi32, #tpu.memory_space<smem>>
    %c0_i32_64 = arith.constant 0 : i32
    %92 = arith.maxsi %91, %c0_i32_64 : i32
    %c15_i32_65 = arith.constant 15 : i32
    %93 = arith.minsi %92, %c15_i32_65 : i32
    %c13_i32 = arith.constant 13 : i32
    %c0_i32_66 = arith.constant 0 : i32
    %94 = tpu.memref_slice %arg2[%93, %c0_i32_66] : memref<16x128xf32, #tpu.memory_space<any>> -> memref<1x128xf32, #tpu.memory_space<any>>
    %c13_i32_67 = arith.constant 13 : i32
    %c0_i32_68 = arith.constant 0 : i32
    %95 = tpu.memref_slice %arg6[%c13_i32_67, %c0_i32_68] : memref<16x128xf32, #tpu.memory_space<vmem>> -> memref<1x128xf32, #tpu.memory_space<vmem>>
    %96 = tpu.memref_slice %arg7[%c13_i32] : memref<16x!tpu.dma_semaphore, #tpu.memory_space<semaphore_mem>> -> memref<1x!tpu.dma_semaphore, #tpu.memory_space<semaphore_mem>>
    %97 = tpu.memref_squeeze %96 : memref<1x!tpu.dma_semaphore, #tpu.memory_space<semaphore_mem>> -> memref<!tpu.dma_semaphore, #tpu.memory_space<semaphore_mem>>
    tpu.enqueue_dma source(%94 : memref<1x128xf32, #tpu.memory_space<any>>) target(%95 : memref<1x128xf32, #tpu.memory_space<vmem>>) target_semaphore(%97 : memref<!tpu.dma_semaphore, #tpu.memory_space<semaphore_mem>>)
    %c14 = arith.constant 14 : index
    %98 = memref.load %arg0[%c14] : memref<16xi32, #tpu.memory_space<smem>>
    %c0_i32_69 = arith.constant 0 : i32
    %99 = arith.maxsi %98, %c0_i32_69 : i32
    %c15_i32_70 = arith.constant 15 : i32
    %100 = arith.minsi %99, %c15_i32_70 : i32
    %c14_i32 = arith.constant 14 : i32
    %c0_i32_71 = arith.constant 0 : i32
    %101 = tpu.memref_slice %arg2[%100, %c0_i32_71] : memref<16x128xf32, #tpu.memory_space<any>> -> memref<1x128xf32, #tpu.memory_space<any>>
    %c14_i32_72 = arith.constant 14 : i32
    %c0_i32_73 = arith.constant 0 : i32
    %102 = tpu.memref_slice %arg6[%c14_i32_72, %c0_i32_73] : memref<16x128xf32, #tpu.memory_space<vmem>> -> memref<1x128xf32, #tpu.memory_space<vmem>>
    %103 = tpu.memref_slice %arg7[%c14_i32] : memref<16x!tpu.dma_semaphore, #tpu.memory_space<semaphore_mem>> -> memref<1x!tpu.dma_semaphore, #tpu.memory_space<semaphore_mem>>
    %104 = tpu.memref_squeeze %103 : memref<1x!tpu.dma_semaphore, #tpu.memory_space<semaphore_mem>> -> memref<!tpu.dma_semaphore, #tpu.memory_space<semaphore_mem>>
    tpu.enqueue_dma source(%101 : memref<1x128xf32, #tpu.memory_space<any>>) target(%102 : memref<1x128xf32, #tpu.memory_space<vmem>>) target_semaphore(%104 : memref<!tpu.dma_semaphore, #tpu.memory_space<semaphore_mem>>)
    %c15 = arith.constant 15 : index
    %105 = memref.load %arg0[%c15] : memref<16xi32, #tpu.memory_space<smem>>
    %c0_i32_74 = arith.constant 0 : i32
    %106 = arith.maxsi %105, %c0_i32_74 : i32
    %c15_i32_75 = arith.constant 15 : i32
    %107 = arith.minsi %106, %c15_i32_75 : i32
    %c15_i32_76 = arith.constant 15 : i32
    %c0_i32_77 = arith.constant 0 : i32
    %108 = tpu.memref_slice %arg2[%107, %c0_i32_77] : memref<16x128xf32, #tpu.memory_space<any>> -> memref<1x128xf32, #tpu.memory_space<any>>
    %c15_i32_78 = arith.constant 15 : i32
    %c0_i32_79 = arith.constant 0 : i32
    %109 = tpu.memref_slice %arg6[%c15_i32_78, %c0_i32_79] : memref<16x128xf32, #tpu.memory_space<vmem>> -> memref<1x128xf32, #tpu.memory_space<vmem>>
    %110 = tpu.memref_slice %arg7[%c15_i32_76] : memref<16x!tpu.dma_semaphore, #tpu.memory_space<semaphore_mem>> -> memref<1x!tpu.dma_semaphore, #tpu.memory_space<semaphore_mem>>
    %111 = tpu.memref_squeeze %110 : memref<1x!tpu.dma_semaphore, #tpu.memory_space<semaphore_mem>> -> memref<!tpu.dma_semaphore, #tpu.memory_space<semaphore_mem>>
    tpu.enqueue_dma source(%108 : memref<1x128xf32, #tpu.memory_space<any>>) target(%109 : memref<1x128xf32, #tpu.memory_space<vmem>>) target_semaphore(%111 : memref<!tpu.dma_semaphore, #tpu.memory_space<semaphore_mem>>)
    %c0_i32_80 = arith.constant 0 : i32
    %c0_i32_81 = arith.constant 0 : i32
    %112 = tpu.memref_slice %arg2[%2, %c0_i32_81] : memref<16x128xf32, #tpu.memory_space<any>> -> memref<1x128xf32, #tpu.memory_space<any>>
    %c0_i32_82 = arith.constant 0 : i32
    %c0_i32_83 = arith.constant 0 : i32
    %113 = tpu.memref_slice %arg6[%c0_i32_82, %c0_i32_83] : memref<16x128xf32, #tpu.memory_space<vmem>> -> memref<1x128xf32, #tpu.memory_space<vmem>>
    %114 = tpu.memref_slice %arg7[%c0_i32_80] : memref<16x!tpu.dma_semaphore, #tpu.memory_space<semaphore_mem>> -> memref<1x!tpu.dma_semaphore, #tpu.memory_space<semaphore_mem>>
    %115 = tpu.memref_squeeze %114 : memref<1x!tpu.dma_semaphore, #tpu.memory_space<semaphore_mem>> -> memref<!tpu.dma_semaphore, #tpu.memory_space<semaphore_mem>>
    tpu.wait_dma2 semaphore(%115 : memref<!tpu.dma_semaphore, #tpu.memory_space<semaphore_mem>>) src(%112 : memref<1x128xf32, #tpu.memory_space<any>>) dst(%113 : memref<1x128xf32, #tpu.memory_space<vmem>>)
    %c1_i32_84 = arith.constant 1 : i32
    %c0_i32_85 = arith.constant 0 : i32
    %116 = tpu.memref_slice %arg2[%9, %c0_i32_85] : memref<16x128xf32, #tpu.memory_space<any>> -> memref<1x128xf32, #tpu.memory_space<any>>
    %c1_i32_86 = arith.constant 1 : i32
    %c0_i32_87 = arith.constant 0 : i32
    %117 = tpu.memref_slice %arg6[%c1_i32_86, %c0_i32_87] : memref<16x128xf32, #tpu.memory_space<vmem>> -> memref<1x128xf32, #tpu.memory_space<vmem>>
    %118 = tpu.memref_slice %arg7[%c1_i32_84] : memref<16x!tpu.dma_semaphore, #tpu.memory_space<semaphore_mem>> -> memref<1x!tpu.dma_semaphore, #tpu.memory_space<semaphore_mem>>
    %119 = tpu.memref_squeeze %118 : memref<1x!tpu.dma_semaphore, #tpu.memory_space<semaphore_mem>> -> memref<!tpu.dma_semaphore, #tpu.memory_space<semaphore_mem>>
    tpu.wait_dma2 semaphore(%119 : memref<!tpu.dma_semaphore, #tpu.memory_space<semaphore_mem>>) src(%116 : memref<1x128xf32, #tpu.memory_space<any>>) dst(%117 : memref<1x128xf32, #tpu.memory_space<vmem>>)
    %c2_i32_88 = arith.constant 2 : i32
    %c0_i32_89 = arith.constant 0 : i32
    %120 = tpu.memref_slice %arg2[%16, %c0_i32_89] : memref<16x128xf32, #tpu.memory_space<any>> -> memref<1x128xf32, #tpu.memory_space<any>>
    %c2_i32_90 = arith.constant 2 : i32
    %c0_i32_91 = arith.constant 0 : i32
    %121 = tpu.memref_slice %arg6[%c2_i32_90, %c0_i32_91] : memref<16x128xf32, #tpu.memory_space<vmem>> -> memref<1x128xf32, #tpu.memory_space<vmem>>
    %122 = tpu.memref_slice %arg7[%c2_i32_88] : memref<16x!tpu.dma_semaphore, #tpu.memory_space<semaphore_mem>> -> memref<1x!tpu.dma_semaphore, #tpu.memory_space<semaphore_mem>>
    %123 = tpu.memref_squeeze %122 : memref<1x!tpu.dma_semaphore, #tpu.memory_space<semaphore_mem>> -> memref<!tpu.dma_semaphore, #tpu.memory_space<semaphore_mem>>
    tpu.wait_dma2 semaphore(%123 : memref<!tpu.dma_semaphore, #tpu.memory_space<semaphore_mem>>) src(%120 : memref<1x128xf32, #tpu.memory_space<any>>) dst(%121 : memref<1x128xf32, #tpu.memory_space<vmem>>)
    %c3_i32_92 = arith.constant 3 : i32
    %c0_i32_93 = arith.constant 0 : i32
    %124 = tpu.memref_slice %arg2[%23, %c0_i32_93] : memref<16x128xf32, #tpu.memory_space<any>> -> memref<1x128xf32, #tpu.memory_space<any>>
    %c3_i32_94 = arith.constant 3 : i32
    %c0_i32_95 = arith.constant 0 : i32
    %125 = tpu.memref_slice %arg6[%c3_i32_94, %c0_i32_95] : memref<16x128xf32, #tpu.memory_space<vmem>> -> memref<1x128xf32, #tpu.memory_space<vmem>>
    %126 = tpu.memref_slice %arg7[%c3_i32_92] : memref<16x!tpu.dma_semaphore, #tpu.memory_space<semaphore_mem>> -> memref<1x!tpu.dma_semaphore, #tpu.memory_space<semaphore_mem>>
    %127 = tpu.memref_squeeze %126 : memref<1x!tpu.dma_semaphore, #tpu.memory_space<semaphore_mem>> -> memref<!tpu.dma_semaphore, #tpu.memory_space<semaphore_mem>>
    tpu.wait_dma2 semaphore(%127 : memref<!tpu.dma_semaphore, #tpu.memory_space<semaphore_mem>>) src(%124 : memref<1x128xf32, #tpu.memory_space<any>>) dst(%125 : memref<1x128xf32, #tpu.memory_space<vmem>>)
    %c4_i32_96 = arith.constant 4 : i32
    %c0_i32_97 = arith.constant 0 : i32
    %128 = tpu.memref_slice %arg2[%30, %c0_i32_97] : memref<16x128xf32, #tpu.memory_space<any>> -> memref<1x128xf32, #tpu.memory_space<any>>
    %c4_i32_98 = arith.constant 4 : i32
    %c0_i32_99 = arith.constant 0 : i32
    %129 = tpu.memref_slice %arg6[%c4_i32_98, %c0_i32_99] : memref<16x128xf32, #tpu.memory_space<vmem>> -> memref<1x128xf32, #tpu.memory_space<vmem>>
    %130 = tpu.memref_slice %arg7[%c4_i32_96] : memref<16x!tpu.dma_semaphore, #tpu.memory_space<semaphore_mem>> -> memref<1x!tpu.dma_semaphore, #tpu.memory_space<semaphore_mem>>
    %131 = tpu.memref_squeeze %130 : memref<1x!tpu.dma_semaphore, #tpu.memory_space<semaphore_mem>> -> memref<!tpu.dma_semaphore, #tpu.memory_space<semaphore_mem>>
    tpu.wait_dma2 semaphore(%131 : memref<!tpu.dma_semaphore, #tpu.memory_space<semaphore_mem>>) src(%128 : memref<1x128xf32, #tpu.memory_space<any>>) dst(%129 : memref<1x128xf32, #tpu.memory_space<vmem>>)
    %c5_i32_100 = arith.constant 5 : i32
    %c0_i32_101 = arith.constant 0 : i32
    %132 = tpu.memref_slice %arg2[%37, %c0_i32_101] : memref<16x128xf32, #tpu.memory_space<any>> -> memref<1x128xf32, #tpu.memory_space<any>>
    %c5_i32_102 = arith.constant 5 : i32
    %c0_i32_103 = arith.constant 0 : i32
    %133 = tpu.memref_slice %arg6[%c5_i32_102, %c0_i32_103] : memref<16x128xf32, #tpu.memory_space<vmem>> -> memref<1x128xf32, #tpu.memory_space<vmem>>
    %134 = tpu.memref_slice %arg7[%c5_i32_100] : memref<16x!tpu.dma_semaphore, #tpu.memory_space<semaphore_mem>> -> memref<1x!tpu.dma_semaphore, #tpu.memory_space<semaphore_mem>>
    %135 = tpu.memref_squeeze %134 : memref<1x!tpu.dma_semaphore, #tpu.memory_space<semaphore_mem>> -> memref<!tpu.dma_semaphore, #tpu.memory_space<semaphore_mem>>
    tpu.wait_dma2 semaphore(%135 : memref<!tpu.dma_semaphore, #tpu.memory_space<semaphore_mem>>) src(%132 : memref<1x128xf32, #tpu.memory_space<any>>) dst(%133 : memref<1x128xf32, #tpu.memory_space<vmem>>)
    %c6_i32_104 = arith.constant 6 : i32
    %c0_i32_105 = arith.constant 0 : i32
    %136 = tpu.memref_slice %arg2[%44, %c0_i32_105] : memref<16x128xf32, #tpu.memory_space<any>> -> memref<1x128xf32, #tpu.memory_space<any>>
    %c6_i32_106 = arith.constant 6 : i32
    %c0_i32_107 = arith.constant 0 : i32
    %137 = tpu.memref_slice %arg6[%c6_i32_106, %c0_i32_107] : memref<16x128xf32, #tpu.memory_space<vmem>> -> memref<1x128xf32, #tpu.memory_space<vmem>>
    %138 = tpu.memref_slice %arg7[%c6_i32_104] : memref<16x!tpu.dma_semaphore, #tpu.memory_space<semaphore_mem>> -> memref<1x!tpu.dma_semaphore, #tpu.memory_space<semaphore_mem>>
    %139 = tpu.memref_squeeze %138 : memref<1x!tpu.dma_semaphore, #tpu.memory_space<semaphore_mem>> -> memref<!tpu.dma_semaphore, #tpu.memory_space<semaphore_mem>>
    tpu.wait_dma2 semaphore(%139 : memref<!tpu.dma_semaphore, #tpu.memory_space<semaphore_mem>>) src(%136 : memref<1x128xf32, #tpu.memory_space<any>>) dst(%137 : memref<1x128xf32, #tpu.memory_space<vmem>>)
    %c7_i32_108 = arith.constant 7 : i32
    %c0_i32_109 = arith.constant 0 : i32
    %140 = tpu.memref_slice %arg2[%51, %c0_i32_109] : memref<16x128xf32, #tpu.memory_space<any>> -> memref<1x128xf32, #tpu.memory_space<any>>
    %c7_i32_110 = arith.constant 7 : i32
    %c0_i32_111 = arith.constant 0 : i32
    %141 = tpu.memref_slice %arg6[%c7_i32_110, %c0_i32_111] : memref<16x128xf32, #tpu.memory_space<vmem>> -> memref<1x128xf32, #tpu.memory_space<vmem>>
    %142 = tpu.memref_slice %arg7[%c7_i32_108] : memref<16x!tpu.dma_semaphore, #tpu.memory_space<semaphore_mem>> -> memref<1x!tpu.dma_semaphore, #tpu.memory_space<semaphore_mem>>
    %143 = tpu.memref_squeeze %142 : memref<1x!tpu.dma_semaphore, #tpu.memory_space<semaphore_mem>> -> memref<!tpu.dma_semaphore, #tpu.memory_space<semaphore_mem>>
    tpu.wait_dma2 semaphore(%143 : memref<!tpu.dma_semaphore, #tpu.memory_space<semaphore_mem>>) src(%140 : memref<1x128xf32, #tpu.memory_space<any>>) dst(%141 : memref<1x128xf32, #tpu.memory_space<vmem>>)
    %c8_i32_112 = arith.constant 8 : i32
    %c0_i32_113 = arith.constant 0 : i32
    %144 = tpu.memref_slice %arg2[%58, %c0_i32_113] : memref<16x128xf32, #tpu.memory_space<any>> -> memref<1x128xf32, #tpu.memory_space<any>>
    %c8_i32_114 = arith.constant 8 : i32
    %c0_i32_115 = arith.constant 0 : i32
    %145 = tpu.memref_slice %arg6[%c8_i32_114, %c0_i32_115] : memref<16x128xf32, #tpu.memory_space<vmem>> -> memref<1x128xf32, #tpu.memory_space<vmem>>
    %146 = tpu.memref_slice %arg7[%c8_i32_112] : memref<16x!tpu.dma_semaphore, #tpu.memory_space<semaphore_mem>> -> memref<1x!tpu.dma_semaphore, #tpu.memory_space<semaphore_mem>>
    %147 = tpu.memref_squeeze %146 : memref<1x!tpu.dma_semaphore, #tpu.memory_space<semaphore_mem>> -> memref<!tpu.dma_semaphore, #tpu.memory_space<semaphore_mem>>
    tpu.wait_dma2 semaphore(%147 : memref<!tpu.dma_semaphore, #tpu.memory_space<semaphore_mem>>) src(%144 : memref<1x128xf32, #tpu.memory_space<any>>) dst(%145 : memref<1x128xf32, #tpu.memory_space<vmem>>)
    %c9_i32_116 = arith.constant 9 : i32
    %c0_i32_117 = arith.constant 0 : i32
    %148 = tpu.memref_slice %arg2[%65, %c0_i32_117] : memref<16x128xf32, #tpu.memory_space<any>> -> memref<1x128xf32, #tpu.memory_space<any>>
    %c9_i32_118 = arith.constant 9 : i32
    %c0_i32_119 = arith.constant 0 : i32
    %149 = tpu.memref_slice %arg6[%c9_i32_118, %c0_i32_119] : memref<16x128xf32, #tpu.memory_space<vmem>> -> memref<1x128xf32, #tpu.memory_space<vmem>>
    %150 = tpu.memref_slice %arg7[%c9_i32_116] : memref<16x!tpu.dma_semaphore, #tpu.memory_space<semaphore_mem>> -> memref<1x!tpu.dma_semaphore, #tpu.memory_space<semaphore_mem>>
    %151 = tpu.memref_squeeze %150 : memref<1x!tpu.dma_semaphore, #tpu.memory_space<semaphore_mem>> -> memref<!tpu.dma_semaphore, #tpu.memory_space<semaphore_mem>>
    tpu.wait_dma2 semaphore(%151 : memref<!tpu.dma_semaphore, #tpu.memory_space<semaphore_mem>>) src(%148 : memref<1x128xf32, #tpu.memory_space<any>>) dst(%149 : memref<1x128xf32, #tpu.memory_space<vmem>>)
    %c10_i32_120 = arith.constant 10 : i32
    %c0_i32_121 = arith.constant 0 : i32
    %152 = tpu.memref_slice %arg2[%72, %c0_i32_121] : memref<16x128xf32, #tpu.memory_space<any>> -> memref<1x128xf32, #tpu.memory_space<any>>
    %c10_i32_122 = arith.constant 10 : i32
    %c0_i32_123 = arith.constant 0 : i32
    %153 = tpu.memref_slice %arg6[%c10_i32_122, %c0_i32_123] : memref<16x128xf32, #tpu.memory_space<vmem>> -> memref<1x128xf32, #tpu.memory_space<vmem>>
    %154 = tpu.memref_slice %arg7[%c10_i32_120] : memref<16x!tpu.dma_semaphore, #tpu.memory_space<semaphore_mem>> -> memref<1x!tpu.dma_semaphore, #tpu.memory_space<semaphore_mem>>
    %155 = tpu.memref_squeeze %154 : memref<1x!tpu.dma_semaphore, #tpu.memory_space<semaphore_mem>> -> memref<!tpu.dma_semaphore, #tpu.memory_space<semaphore_mem>>
    tpu.wait_dma2 semaphore(%155 : memref<!tpu.dma_semaphore, #tpu.memory_space<semaphore_mem>>) src(%152 : memref<1x128xf32, #tpu.memory_space<any>>) dst(%153 : memref<1x128xf32, #tpu.memory_space<vmem>>)
    %c11_i32_124 = arith.constant 11 : i32
    %c0_i32_125 = arith.constant 0 : i32
    %156 = tpu.memref_slice %arg2[%79, %c0_i32_125] : memref<16x128xf32, #tpu.memory_space<any>> -> memref<1x128xf32, #tpu.memory_space<any>>
    %c11_i32_126 = arith.constant 11 : i32
    %c0_i32_127 = arith.constant 0 : i32
    %157 = tpu.memref_slice %arg6[%c11_i32_126, %c0_i32_127] : memref<16x128xf32, #tpu.memory_space<vmem>> -> memref<1x128xf32, #tpu.memory_space<vmem>>
    %158 = tpu.memref_slice %arg7[%c11_i32_124] : memref<16x!tpu.dma_semaphore, #tpu.memory_space<semaphore_mem>> -> memref<1x!tpu.dma_semaphore, #tpu.memory_space<semaphore_mem>>
    %159 = tpu.memref_squeeze %158 : memref<1x!tpu.dma_semaphore, #tpu.memory_space<semaphore_mem>> -> memref<!tpu.dma_semaphore, #tpu.memory_space<semaphore_mem>>
    tpu.wait_dma2 semaphore(%159 : memref<!tpu.dma_semaphore, #tpu.memory_space<semaphore_mem>>) src(%156 : memref<1x128xf32, #tpu.memory_space<any>>) dst(%157 : memref<1x128xf32, #tpu.memory_space<vmem>>)
    %c12_i32_128 = arith.constant 12 : i32
    %c0_i32_129 = arith.constant 0 : i32
    %160 = tpu.memref_slice %arg2[%86, %c0_i32_129] : memref<16x128xf32, #tpu.memory_space<any>> -> memref<1x128xf32, #tpu.memory_space<any>>
    %c12_i32_130 = arith.constant 12 : i32
    %c0_i32_131 = arith.constant 0 : i32
    %161 = tpu.memref_slice %arg6[%c12_i32_130, %c0_i32_131] : memref<16x128xf32, #tpu.memory_space<vmem>> -> memref<1x128xf32, #tpu.memory_space<vmem>>
    %162 = tpu.memref_slice %arg7[%c12_i32_128] : memref<16x!tpu.dma_semaphore, #tpu.memory_space<semaphore_mem>> -> memref<1x!tpu.dma_semaphore, #tpu.memory_space<semaphore_mem>>
    %163 = tpu.memref_squeeze %162 : memref<1x!tpu.dma_semaphore, #tpu.memory_space<semaphore_mem>> -> memref<!tpu.dma_semaphore, #tpu.memory_space<semaphore_mem>>
    tpu.wait_dma2 semaphore(%163 : memref<!tpu.dma_semaphore, #tpu.memory_space<semaphore_mem>>) src(%160 : memref<1x128xf32, #tpu.memory_space<any>>) dst(%161 : memref<1x128xf32, #tpu.memory_space<vmem>>)
    %c13_i32_132 = arith.constant 13 : i32
    %c0_i32_133 = arith.constant 0 : i32
    %164 = tpu.memref_slice %arg2[%93, %c0_i32_133] : memref<16x128xf32, #tpu.memory_space<any>> -> memref<1x128xf32, #tpu.memory_space<any>>
    %c13_i32_134 = arith.constant 13 : i32
    %c0_i32_135 = arith.constant 0 : i32
    %165 = tpu.memref_slice %arg6[%c13_i32_134, %c0_i32_135] : memref<16x128xf32, #tpu.memory_space<vmem>> -> memref<1x128xf32, #tpu.memory_space<vmem>>
    %166 = tpu.memref_slice %arg7[%c13_i32_132] : memref<16x!tpu.dma_semaphore, #tpu.memory_space<semaphore_mem>> -> memref<1x!tpu.dma_semaphore, #tpu.memory_space<semaphore_mem>>
    %167 = tpu.memref_squeeze %166 : memref<1x!tpu.dma_semaphore, #tpu.memory_space<semaphore_mem>> -> memref<!tpu.dma_semaphore, #tpu.memory_space<semaphore_mem>>
    tpu.wait_dma2 semaphore(%167 : memref<!tpu.dma_semaphore, #tpu.memory_space<semaphore_mem>>) src(%164 : memref<1x128xf32, #tpu.memory_space<any>>) dst(%165 : memref<1x128xf32, #tpu.memory_space<vmem>>)
    %c14_i32_136 = arith.constant 14 : i32
    %c0_i32_137 = arith.constant 0 : i32
    %168 = tpu.memref_slice %arg2[%100, %c0_i32_137] : memref<16x128xf32, #tpu.memory_space<any>> -> memref<1x128xf32, #tpu.memory_space<any>>
    %c14_i32_138 = arith.constant 14 : i32
    %c0_i32_139 = arith.constant 0 : i32
    %169 = tpu.memref_slice %arg6[%c14_i32_138, %c0_i32_139] : memref<16x128xf32, #tpu.memory_space<vmem>> -> memref<1x128xf32, #tpu.memory_space<vmem>>
    %170 = tpu.memref_slice %arg7[%c14_i32_136] : memref<16x!tpu.dma_semaphore, #tpu.memory_space<semaphore_mem>> -> memref<1x!tpu.dma_semaphore, #tpu.memory_space<semaphore_mem>>
    %171 = tpu.memref_squeeze %170 : memref<1x!tpu.dma_semaphore, #tpu.memory_space<semaphore_mem>> -> memref<!tpu.dma_semaphore, #tpu.memory_space<semaphore_mem>>
    tpu.wait_dma2 semaphore(%171 : memref<!tpu.dma_semaphore, #tpu.memory_space<semaphore_mem>>) src(%168 : memref<1x128xf32, #tpu.memory_space<any>>) dst(%169 : memref<1x128xf32, #tpu.memory_space<vmem>>)
    %c15_i32_140 = arith.constant 15 : i32
    %c0_i32_141 = arith.constant 0 : i32
    %172 = tpu.memref_slice %arg2[%107, %c0_i32_141] : memref<16x128xf32, #tpu.memory_space<any>> -> memref<1x128xf32, #tpu.memory_space<any>>
    %c15_i32_142 = arith.constant 15 : i32
    %c0_i32_143 = arith.constant 0 : i32
    %173 = tpu.memref_slice %arg6[%c15_i32_142, %c0_i32_143] : memref<16x128xf32, #tpu.memory_space<vmem>> -> memref<1x128xf32, #tpu.memory_space<vmem>>
    %174 = tpu.memref_slice %arg7[%c15_i32_140] : memref<16x!tpu.dma_semaphore, #tpu.memory_space<semaphore_mem>> -> memref<1x!tpu.dma_semaphore, #tpu.memory_space<semaphore_mem>>
    %175 = tpu.memref_squeeze %174 : memref<1x!tpu.dma_semaphore, #tpu.memory_space<semaphore_mem>> -> memref<!tpu.dma_semaphore, #tpu.memory_space<semaphore_mem>>
    tpu.wait_dma2 semaphore(%175 : memref<!tpu.dma_semaphore, #tpu.memory_space<semaphore_mem>>) src(%172 : memref<1x128xf32, #tpu.memory_space<any>>) dst(%173 : memref<1x128xf32, #tpu.memory_space<vmem>>)
    %c0_144 = arith.constant 0 : index
    %176 = memref.load %arg1[%c0_144] : memref<2xi32, #tpu.memory_space<smem>>
    %c0_145 = arith.constant 0 : index
    %c0_146 = arith.constant 0 : index
    %177 = vector.load %arg6[%c0_145, %c0_146] : memref<16x128xf32, #tpu.memory_space<vmem>>, vector<16x128xf32>
    %178 = tpu.iota {dimensions = array<i32: 0>} : vector<16x128xi32>
    %179 = vector.broadcast %176 : i32 to vector<16x128xi32>
    %180 = arith.cmpi slt, %178, %179 : vector<16x128xi32>
    %cst = arith.constant 0.000000e+00 : f32
    %181 = vector.broadcast %cst : f32 to vector<16x128xf32>
    %182 = arith.select %180, %177, %181 : vector<16x128xi1>, vector<16x128xf32>
    %cst_147 = arith.constant dense<0.000000e+00> : vector<128xf32>
    %183 = vector.multi_reduction <add>, %182, %cst_147 [0] : vector<16x128xf32> to vector<128xf32>
    %184 = vector.shape_cast %183 : vector<128xf32> to vector<1x128xf32>
    %c1_i32_148 = arith.constant 1 : i32
    %185 = arith.maxsi %176, %c1_i32_148 : i32
    %186 = arith.sitofp %185 : i32 to f32
    %cst_149 = arith.constant 1.000000e+00 : f32
    %187 = arith.divf %cst_149, %186 : f32
    %188 = vector.broadcast %187 : f32 to vector<1x128xf32>
    %189 = arith.mulf %184, %188 : vector<1x128xf32>
    %c0_150 = arith.constant 0 : index
    %c0_151 = arith.constant 0 : index
    %190 = vector.load %arg3[%c0_150, %c0_151] : memref<128x128xf32, #tpu.memory_space<vmem>>, vector<128x128xf32>
    %cst_152 = arith.constant dense<0.000000e+00> : vector<1x128xf32>
    %191 = tpu.matmul %189, %190, %cst_152 {dimension_numbers = #tpu.dot_dimension_numbers<[1], [0], [0], [1], [0, 0, 1, 1], [], []>} : vector<1x128xf32>, vector<128x128xf32>, vector<1x128xf32> -> vector<1x128xf32>
    %c0_153 = arith.constant 0 : index
    %c0_154 = arith.constant 0 : index
    %192 = vector.load %arg4[%c0_153, %c0_154] : memref<1x128xf32, #tpu.memory_space<vmem>>, vector<1x128xf32>
    %193 = arith.addf %191, %192 : vector<1x128xf32>
    %cst_155 = arith.constant dense<0xFF800000> : vector<1xf32>
    %194 = vector.multi_reduction <maximumf>, %193, %cst_155 [1] : vector<1x128xf32> to vector<1xf32>
    %195 = vector.shape_cast %194 : vector<1xf32> to vector<1x1xf32>
    %196 = vector.broadcast %195 : vector<1x1xf32> to vector<1x128xf32>
    %197 = arith.subf %193, %196 : vector<1x128xf32>
    %198 = math.exp %197 : vector<1x128xf32>
    %cst_156 = arith.constant dense<0.000000e+00> : vector<1xf32>
    %199 = vector.multi_reduction <add>, %198, %cst_156 [1] : vector<1x128xf32> to vector<1xf32>
    %200 = vector.shape_cast %199 : vector<1xf32> to vector<1x1xf32>
    %201 = math.log %200 : vector<1x1xf32>
    %202 = arith.addf %195, %201 : vector<1x1xf32>
    %203 = vector.broadcast %202 : vector<1x1xf32> to vector<1x128xf32>
    %204 = arith.subf %193, %203 : vector<1x128xf32>
    %c1_157 = arith.constant 1 : index
    %205 = memref.load %arg1[%c1_157] : memref<2xi32, #tpu.memory_space<smem>>
    %206 = tpu.iota {dimensions = array<i32: 1>} : vector<1x128xi32>
    %207 = vector.broadcast %205 : i32 to vector<1x128xi32>
    %208 = arith.cmpi eq, %206, %207 : vector<1x128xi32>
    %cst_158 = arith.constant 0.000000e+00 : f32
    %209 = vector.broadcast %cst_158 : f32 to vector<1x128xf32>
    %210 = arith.select %208, %204, %209 : vector<1x128xi1>, vector<1x128xf32>
    %211 = vector.shape_cast %210 : vector<1x128xf32> to vector<1x1x128xf32>
    %cst_159 = arith.constant dense<0.000000e+00> : vector<1xf32>
    %212 = vector.multi_reduction <add>, %211, %cst_159 [1, 2] : vector<1x1x128xf32> to vector<1xf32>
    %213 = vector.shape_cast %212 : vector<1xf32> to vector<1x1x1xf32>
    %214 = vector.extract %213[0, 0, 0] : f32 from vector<1x1x1xf32>
    %c0_i32_160 = arith.constant 0 : i32
    %215 = arith.cmpi sge, %205, %c0_i32_160 : i32
    %cst_161 = arith.constant 0.000000e+00 : f32
    %216 = arith.subf %cst_161, %214 : f32
    %cst_162 = arith.constant 0.000000e+00 : f32
    %217 = arith.select %215, %216, %cst_162 : f32
    %218 = tpu.iota {dimensions = array<i32: 0>} : vector<8x128xi32>
    %219 = tpu.iota {dimensions = array<i32: 1>} : vector<8x128xi32>
    %220 = vector.shape_cast %193 : vector<1x128xf32> to vector<1x128xf32>
    %221 = vector.broadcast %220 : vector<1x128xf32> to vector<8x128xf32>
    %222 = vector.shape_cast %204 : vector<1x128xf32> to vector<1x128xf32>
    %223 = vector.broadcast %222 : vector<1x128xf32> to vector<8x128xf32>
    %c0_i32_163 = arith.constant 0 : i32
    %224 = vector.broadcast %c0_i32_163 : i32 to vector<8x128xi32>
    %225 = arith.cmpi eq, %219, %224 : vector<8x128xi32>
    %cst_164 = arith.constant 0.000000e+00 : f32
    %226 = vector.broadcast %217 : f32 to vector<8x128xf32>
    %227 = vector.broadcast %cst_164 : f32 to vector<8x128xf32>
    %228 = arith.select %225, %226, %227 : vector<8x128xi1>, vector<8x128xf32>
    %c0_i32_165 = arith.constant 0 : i32
    %229 = vector.broadcast %c0_i32_165 : i32 to vector<8x128xi32>
    %230 = arith.cmpi eq, %218, %229 : vector<8x128xi32>
    %c1_i32_166 = arith.constant 1 : i32
    %231 = vector.broadcast %c1_i32_166 : i32 to vector<8x128xi32>
    %232 = arith.cmpi eq, %218, %231 : vector<8x128xi32>
    %c2_i32_167 = arith.constant 2 : i32
    %233 = vector.broadcast %c2_i32_167 : i32 to vector<8x128xi32>
    %234 = arith.cmpi eq, %218, %233 : vector<8x128xi32>
    %cst_168 = arith.constant 0.000000e+00 : f32
    %235 = vector.broadcast %cst_168 : f32 to vector<8x128xf32>
    %236 = arith.select %234, %228, %235 : vector<8x128xi1>, vector<8x128xf32>
    %237 = arith.select %232, %223, %236 : vector<8x128xi1>, vector<8x128xf32>
    %238 = arith.select %230, %221, %237 : vector<8x128xi1>, vector<8x128xf32>
    %c0_169 = arith.constant 0 : index
    %c0_170 = arith.constant 0 : index
    %239 = vector.load %arg5[%c0_169, %c0_170] : memref<8x128xf32, #tpu.memory_space<vmem>>, vector<8x128xf32>
    tpu.vector_store %arg5[%c0_169, %c0_170], %238 {strides = array<i32>} : memref<8x128xf32, #tpu.memory_space<vmem>>, vector<8x128xf32>,
    return
  }
}

</mosaic_0001>

<bundles_post_ra>
// kernel: _run_kernel.1
= control target key start
LH: loop header
LB: loop body
LE: loop exit
PB: predicated region body
PF: predicated region fallthrough
CT: control target
= control target key end

     0   :  { %10 = vsyncpa [#allocation7], 0  ;;  %s1931_s0 = inlined_call_operand.hbm [shape: s32[16], index: 0, kind: input, shape index: {}]   ;;  %s1932_s1 = inlined_call_operand.vmem [shape: s32[2], index: 1, kind: input, shape index: {}]   ;;  %s1933_s2 = inlined_call_operand.hbm [shape: f32[16,128], index: 2, kind: input, shape index: {}]   ;;  %s1934_s3 = inlined_call_operand.hbm [shape: f32[128,128], index: 3, kind: input, shape index: {}]   ;;  %s1935_s4 = inlined_call_operand.vmem [shape: f32[1,128], index: 4, kind: input, shape index: {}]   ;;  %s1936_s5 = inlined_call_operand.hbm [shape: f32[8,128], index: 5, kind: output, shape index: {}]  }
   0x1   :  { %11 = vsyncpa [#allocation8], 0 }
   0x2   :  { %12 = vsyncpa [#allocation5], 0 }
   0x3   :  { %13 = vsyncpa [#allocation6], 0  ;;  %s28_s20 = sshll.u32 %s1932_s1, 4  ;;  %s1002_s23 = scalar_lea.hbm %s1931_s0, 16  ;;  %s29_s20 = int_to_ptr.vmem [resolvable:$true] %s28_s20 }
   0x4   :  { %p1003_p0 = scmp.ne.s32.totalorder %s1931_s0, %s1002_s23  ;;  %p1006_p1 = scmp.lt.u32.totalorder %s1002_s23, %s1931_s0 }
   0x6   :  { %p1008_p2 = pnand %p1006_p1, %p1003_p0 }
   0x8   :  { %1011 = shalt.err (!%p1008_p2)
}
   0x9   :  { %s1492_s28 = smov [#allocation4]   ;;  %s1012_s1 = scalar_lea.vmem %s29_s20, 16 }
   0xa   :  { %21 = dma.hbm_to_smem %s1931_s0, 16, %s1492_s28, [#allocation7]  }
   0xb   :  { %p1013_p3 = scmp.ne.s32.totalorder %s29_s20, %s1012_s1  ;;  %p1017_p4 = scmp.lt.s32.totalorder %s29_s20, %s29_s20 }
   0xc   :  { %p1018_p5 = scmp.lt.s32.totalorder %s1012_s1, %s1012_s1 }
   0xe   :  { %p1019_p6 = por %p1018_p5, %p1017_p4 }
  0x10   :  { %p1020_p7 = pnand %p1019_p6, %p1013_p3 }
  0x12   :  { %1023 = shalt.err (!%p1020_p7)
}
  0x13   :  { %s1493_s6 = smov [#allocation9]   ;;  %s1494_s7 = smov [#allocation10]  }
  0x14   :  { %31 = dma.vmem_to_smem %s29_s20, 16, %s1493_s6, [#allocation8]  }
  0x15   :  { %s37_s8 = sshll.u32 %s1494_s7, 4  ;;  %s1024_s11 = scalar_lea.hbm %s1934_s3, 2048  ;;  %s38_s8 = int_to_ptr.vmem [resolvable:$true] %s37_s8 }
  0x16   :  { %p1025_p8 = scmp.ne.s32.totalorder %s1934_s3, %s1024_s11  ;;  %p1028_p9 = scmp.lt.u32.totalorder %s1024_s11, %s1934_s3 }
  0x18   :  { %p1030_p10 = pnand %p1028_p9, %p1025_p8 }
  0x1a   :  { %1033 = shalt.err (!%p1030_p10)
}
  0x1b   :  { %s1034_s15 = scalar_lea.vmem %s38_s8, 2048  ;;  %p1039_p12 = scmp.lt.s32.totalorder %s38_s8, %s38_s8 }
  0x1c   :  { %p1035_p11 = scmp.ne.s32.totalorder %s38_s8, %s1034_s15  ;;  %p1040_p13 = scmp.lt.s32.totalorder %s1034_s15, %s1034_s15 }
  0x1e   :  { %p1041_p0 = por %p1040_p13, %p1039_p12 }
  0x20   :  { %p1042_p1 = pnand %p1041_p0, %p1035_p11 }
  0x22   :  { %1045 = shalt.err (!%p1042_p1)
}
  0x23   :  { %s1495_s16 = smov 128   ;;  %s1496_s17 = smov 8  }
  0x24   :  { %43 = dma.hbm_to_vmem [thread:$0]  %s1934_s3, 2048, %s38_s8, [#allocation5], %s1495_s16, %s1495_s16, %s1496_s17  }
  0x25   :  { %1452 = dma.done.wait [#allocation7], 16  }
  0x26   :  { %1453 = vsyncadd [#allocation7], 4294967280 }
  0x27   :  { %1454 = dma.done.wait [#allocation8], 16  }
  0x28   :  { %1455 = vsyncadd [#allocation8], 4294967280 }
  0x29   :  { %1456 = dma.done.wait [#allocation5], 2048  }
  0x2a   :  { %1457 = vsyncadd [#allocation5], 4294965248 }
  0x2b   :  { %55 = sfence }
  0x2c   :  { %s56_s20 = sld [smem:[#allocation4]]  ;;  %s1497_s21 = smov [#allocation2]  }
  0x2d   :  { %s70_s22 = sshll.u32 %s1497_s21, 4  ;;  %s737_s23 = sld [smem:[#allocation4 + $0x1]]  ;;  %s1574_s22 = int_to_ptr.vmem [resolvable:$true] %s70_s22 }
  0x2e   :  { %s1498_s24 = smov [#allocation2 + $0x1]   ;;  %s1576_s26 = sld [smem:[#allocation4 + $0x2]] }
  0x2f   :  { %s90_s25 = sshll.u32 %s1498_s24, 4  ;;  %s1499_s3 = smov [#allocation2 + $0x2]   ;;  %s1578_s25 = int_to_ptr.vmem [resolvable:$true] %s90_s25 }
  0x30   :  { %s1580_s27 = sshll.u32 %s1499_s3, 4  ;;  %s1582_s28 = sld [smem:[#allocation4 + $0x3]]  ;;  %s111_s27 = int_to_ptr.vmem [resolvable:$true] %s1580_s27 }
  0x31   :  { %s1591_s11 = scalar_lea.hbm %s1933_s2, 256 }
  0x32   :  { %p57_p2 = scmp.gt.s32.totalorder %s56_s20, 0  ;;  %p731_p3 = scmp.lt.s32.totalorder %s56_s20, 15 }
  0x33   :  { %p75_p4 = scmp.gt.s32.totalorder %s737_s23, 0  ;;  %p738_p5 = scmp.lt.s32.totalorder %s737_s23, 15 }
  0x34   :  { %s1941_s20 = smov (!%p57_p2, %s56_s20), 0  ;;  %p95_p6 = scmp.gt.s32.totalorder %s1576_s26, 0 }
  0x35   :  { %s1943_s23 = smov (!%p75_p4, %s737_s23), 0  ;;  %s1945_s20 = smov (!%p731_p3, %s1941_s20), 15 }
  0x36   :  { %s1947_s23 = smov (!%p738_p5, %s1943_s23), 15  ;;  %s736_s29 = sshll.u32 %s1945_s20, 4 }
  0x37   :  { %s62_s6 = scalar_lea.hbm %s1933_s2, %s736_s29  ;;  %s743_s7 = sshll.u32 %s1947_s23, 4 }
  0x38   :  { %s1046_s8 = scalar_lea.hbm %s62_s6, 16  ;;  %p1049_p8 = scmp.lt.u32.totalorder %s62_s6, %s1933_s2 }
  0x39   :  { %p1047_p7 = scmp.ne.s32.totalorder %s62_s6, %s1046_s8  ;;  %p1050_p9 = scmp.lt.u32.totalorder %s1591_s11, %s1046_s8 }
  0x3a   :  { %p1052_p11 = scmp.lt.u32.totalorder %s1046_s8, %s62_s6 }
  0x3b   :  { %p1051_p10 = por %p1050_p9, %p1049_p8 }
  0x3d   :  { %p1053_p12 = por %p1052_p11, %p1051_p10 }
  0x3f   :  { %p1054_p13 = pnand %p1053_p12, %p1047_p7 }
  0x41   :  { %1057 = shalt.err (!%p1054_p13)  }
  0x42   :  { %s1058_s0 = scalar_lea.vmem %s1574_s22, 16  ;;  %s1600_s14 = scalar_lea.vmem %s1574_s22, 256 }
  0x43   :  { %p1059_p0 = scmp.ne.s32.totalorder %s1574_s22, %s1058_s0  ;;  %p1063_p1 = scmp.lt.s32.totalorder %s1574_s22, %s1574_s22 }
  0x44   :  { %p1064_p2 = scmp.lt.s32.totalorder %s1600_s14, %s1058_s0 }
  0x46   :  { %p1065_p3 = por %p1064_p2, %p1063_p1 }
  0x48   :  { %p1066_p4 = pnand %p1065_p3, %p1059_p0 }
  0x4a   :  { %1069 = shalt.err (!%p1066_p4)  }
  0x4b   :  { %73 = dma.hbm_to_vmem [thread:$0]  %s62_s6, 16, %s1574_s22, [#allocation3] }
  0x4c   :  { %s80_s17 = scalar_lea.hbm %s1933_s2, %s743_s7  ;;  %p745_p5 = scmp.lt.s32.totalorder %s1576_s26, 15 }
  0x4d   :  { %s1070_s18 = scalar_lea.hbm %s80_s17, 16  ;;  %p1073_p8 = scmp.lt.u32.totalorder %s80_s17, %s1933_s2 }
  0x4e   :  { %p1071_p7 = scmp.ne.s32.totalorder %s80_s17, %s1070_s18  ;;  %p1074_p9 = scmp.lt.u32.totalorder %s1591_s11, %s1070_s18 }
  0x4f   :  { %p1076_p11 = scmp.lt.u32.totalorder %s1070_s18, %s80_s17 }
  0x50   :  { %p1075_p10 = por %p1074_p9, %p1073_p8 }
  0x52   :  { %p1077_p12 = por %p1076_p11, %p1075_p10 }
  0x54   :  { %p1078_p13 = pnand %p1077_p12, %p1071_p7 }
  0x56   :  { %1081 = shalt.err (!%p1078_p13)  }
  0x57   :  { %s1082_s21 = scalar_lea.vmem %s1578_s25, 16  ;;  %p1087_p1 = scmp.lt.s32.totalorder %s1578_s25, %s1574_s22 }
  0x58   :  { %p1083_p0 = scmp.ne.s32.totalorder %s1578_s25, %s1082_s21  ;;  %p1088_p2 = scmp.lt.s32.totalorder %s1600_s14, %s1082_s21 }
  0x5a   :  { %p1089_p3 = por %p1088_p2, %p1087_p1 }
  0x5c   :  { %p1090_p4 = pnand %p1089_p3, %p1083_p0 }
  0x5e   :  { %1093 = shalt.err (!%p1090_p4)  }
  0x5f   :  { %93 = dma.hbm_to_vmem [thread:$0]  %s80_s17, 16, %s1578_s25, [#allocation3 + $0x1] }
  0x60   :  { %s96_s23 = scalar_select %p95_p6, %s1576_s26, 0 }
  0x61   :  { %p115_p7 = scmp.gt.s32.totalorder %s1582_s28, 0  ;;  %p752_p8 = scmp.lt.s32.totalorder %s1582_s28, 15 }
  0x62   :  { %s1949_s23 = smov (!%p745_p5, %s96_s23), 15 }
  0x63   :  { %s116_s24 = scalar_select %p115_p7, %s1582_s28, 0 }
  0x64   :  { %s750_s3 = sshll.u32 %s1949_s23, 4 }
  0x65   :  { %s100_s1 = scalar_lea.hbm %s1933_s2, %s750_s3 }
  0x66   :  { %s1094_s6 = scalar_lea.hbm %s100_s1, 16  ;;  %p1097_p10 = scmp.lt.u32.totalorder %s100_s1, %s1933_s2 }
  0x67   :  { %p1095_p9 = scmp.ne.s32.totalorder %s100_s1, %s1094_s6  ;;  %p1098_p11 = scmp.lt.u32.totalorder %s1591_s11, %s1094_s6 }
  0x68   :  { %p1100_p6 = scmp.lt.u32.totalorder %s1094_s6, %s100_s1 }
  0x69   :  { %p1099_p12 = por %p1098_p11, %p1097_p10 }
  0x6b   :  { %p1101_p13 = por %p1100_p6, %p1099_p12 }
  0x6d   :  { %p1102_p0 = pnand %p1101_p13, %p1095_p9 }
  0x6f   :  { %1105 = shalt.err (!%p1102_p0)  }
  0x70   :  { %s1106_s25 = scalar_lea.vmem %s111_s27, 16  ;;  %p1111_p1 = scmp.lt.s32.totalorder %s111_s27, %s1574_s22 }
  0x71   :  { %p1107_p5 = scmp.ne.s32.totalorder %s111_s27, %s1106_s25  ;;  %p1112_p2 = scmp.lt.s32.totalorder %s1600_s14, %s1106_s25 }
  0x73   :  { %p1113_p3 = por %p1112_p2, %p1111_p1 }
  0x75   :  { %p1114_p4 = pnand %p1113_p3, %p1107_p5 }
  0x77   :  { %1117 = shalt.err (!%p1114_p4)  }
  0x78   :  { %113 = dma.hbm_to_vmem [thread:$0]  %s100_s1, 16, %s111_s27, [#allocation3 + $0x2] }
  0x79   :  { %s1951_s24 = smov (!%p752_p8, %s116_s24), 15  ;;  %s1500_s26 = smov [#allocation2 + $0x3]  }
  0x7a   :  { %s130_s9 = sshll.u32 %s1500_s26, 4  ;;  %s1640_s10 = sld [smem:[#allocation4 + $0x4]]  ;;  %s131_s9 = int_to_ptr.vmem [resolvable:$true] %s130_s9 }
  0x7b   :  { %s757_s12 = sshll.u32 %s1951_s24, 4 }
  0x7c   :  { %s120_s15 = scalar_lea.hbm %s1933_s2, %s757_s12 }
  0x7d   :  { %s1118_s16 = scalar_lea.hbm %s120_s15, 16  ;;  %p1121_p9 = scmp.lt.u32.totalorder %s120_s15, %s1933_s2 }
  0x7e   :  { %p1119_p7 = scmp.ne.s32.totalorder %s120_s15, %s1118_s16  ;;  %p1122_p10 = scmp.lt.u32.totalorder %s1591_s11, %s1118_s16 }
  0x7f   :  { %p1124_p12 = scmp.lt.u32.totalorder %s1118_s16, %s120_s15 }
  0x80   :  { %p1123_p11 = por %p1122_p10, %p1121_p9 }
  0x82   :  { %p1125_p8 = por %p1124_p12, %p1123_p11 }
  0x84   :  { %p1126_p6 = pnand %p1125_p8, %p1119_p7 }
  0x86   :  { %1129 = shalt.err (!%p1126_p6)  }
  0x87   :  { %s1130_s27 = scalar_lea.vmem %s131_s9, 16  ;;  %p1135_p0 = scmp.lt.s32.totalorder %s131_s9, %s1574_s22 }
  0x88   :  { %p1131_p13 = scmp.ne.s32.totalorder %s131_s9, %s1130_s27  ;;  %p1136_p5 = scmp.lt.s32.totalorder %s1600_s14, %s1130_s27 }
  0x8a   :  { %p1137_p1 = por %p1136_p5, %p1135_p0 }
  0x8c   :  { %p1138_p2 = pnand %p1137_p1, %p1131_p13 }
  0x8e   :  { %1141 = shalt.err (!%p1138_p2)  }
  0x8f   :  { %133 = dma.hbm_to_vmem [thread:$0]  %s120_s15, 16, %s131_s9, [#allocation3 + $0x3] }
  0x90   :  { %s1501_s28 = smov [#allocation2 + $0x4]   ;;  %s1651_s20 = sld [smem:[#allocation4 + $0x5]] }
  0x91   :  { %s150_s19 = sshll.u32 %s1501_s28, 4  ;;  %p135_p3 = scmp.gt.s32.totalorder %s1640_s10, 0  ;;  %s1653_s19 = int_to_ptr.vmem [resolvable:$true] %s150_s19 }
  0x92   :  { %p759_p4 = scmp.lt.s32.totalorder %s1640_s10, 15  ;;  %s1502_s21 = smov [#allocation2 + $0x5]  }
  0x93   :  { %s170_s23 = sshll.u32 %s1502_s21, 4  ;;  %s1657_s24 = sld [smem:[#allocation4 + $0x6]]  ;;  %s1660_s23 = int_to_ptr.vmem [resolvable:$true] %s170_s23 }
  0x94   :  { %s1953_s10 = smov (!%p135_p3, %s1640_s10), 0  ;;  %s1503_s29 = smov [#allocation2 + $0x6]  }
  0x95   :  { %s1955_s10 = smov (!%p759_p4, %s1953_s10), 15  ;;  %s190_s30 = sshll.u32 %s1503_s29, 4  ;;  %s1687_s30 = int_to_ptr.vmem [resolvable:$true] %s190_s30 }
  0x96   :  { %p155_p7 = scmp.gt.s32.totalorder %s1651_s20, 0  ;;  %s764_s3 = sshll.u32 %s1955_s10, 4 }
  0x97   :  { %s140_s7 = scalar_lea.hbm %s1933_s2, %s764_s3 }
  0x98   :  { %s1142_s8 = scalar_lea.hbm %s140_s7, 16  ;;  %p1145_p12 = scmp.lt.u32.totalorder %s140_s7, %s1933_s2 }
  0x99   :  { %p175_p10 = scmp.gt.s32.totalorder %s1657_s24, 0  ;;  %p1143_p11 = scmp.ne.s32.totalorder %s140_s7, %s1142_s8 }
  0x9a   :  { %p1146_p8 = scmp.lt.u32.totalorder %s1591_s11, %s1142_s8  ;;  %p1148_p13 = scmp.lt.u32.totalorder %s1142_s8, %s140_s7 }
  0x9c   :  { %p1147_p6 = por %p1146_p8, %p1145_p12 }
  0x9e   :  { %p1149_p0 = por %p1148_p13, %p1147_p6 }
  0xa0   :  { %p1150_p5 = pnand %p1149_p0, %p1143_p11 }
  0xa2   :  { %1153 = shalt.err (!%p1150_p5)  }
  0xa3   :  { %s1154_s9 = scalar_lea.vmem %s1653_s19, 16  ;;  %p1159_p2 = scmp.lt.s32.totalorder %s1653_s19, %s1574_s22 }
  0xa4   :  { %p1155_p1 = scmp.ne.s32.totalorder %s1653_s19, %s1154_s9  ;;  %p1160_p3 = scmp.lt.s32.totalorder %s1600_s14, %s1154_s9 }
  0xa6   :  { %p1161_p4 = por %p1160_p3, %p1159_p2 }
  0xa8   :  { %p1162_p9 = pnand %p1161_p4, %p1155_p1 }
  0xaa   :  { %1165 = shalt.err (!%p1162_p9)  }
  0xab   :  { %153 = dma.hbm_to_vmem [thread:$0]  %s140_s7, 16, %s1653_s19, [#allocation3 + $0x4] }
  0xac   :  { %s156_s10 = scalar_select %p155_p7, %s1651_s20, 0 }
  0xad   :  { %s176_s12 = scalar_select %p175_p10, %s1657_s24, 0 }
  0xae   :  { %p1937_p11 = scmp.lt.s32.totalorder %s1651_s20, 15  ;;  %p773_p12 = scmp.lt.s32.totalorder %s1657_s24, 15 }
  0xaf   :  { %s1689_s0 = sld [smem:[#allocation4 + $0x7]] }
  0xb0   :  { %s1957_s10 = smov (!%p1937_p11, %s156_s10), 15 }
  0xb1   :  { %s771_s13 = sshll.u32 %s1957_s10, 4 }
  0xb2   :  { %s160_s17 = scalar_lea.hbm %s1933_s2, %s771_s13 }
  0xb3   :  { %s1166_s18 = scalar_lea.hbm %s160_s17, 16  ;;  %p1169_p7 = scmp.lt.u32.totalorder %s160_s17, %s1933_s2 }
  0xb4   :  { %p1167_p9 = scmp.ne.s32.totalorder %s160_s17, %s1166_s18  ;;  %p1170_p8 = scmp.lt.u32.totalorder %s1591_s11, %s1166_s18 }
  0xb5   :  { %p1172_p6 = scmp.lt.u32.totalorder %s1166_s18, %s160_s17 }
  0xb6   :  { %p1171_p10 = por %p1170_p8, %p1169_p7 }
  0xb8   :  { %p1173_p13 = por %p1172_p6, %p1171_p10 }
  0xba   :  { %p1174_p0 = pnand %p1173_p13, %p1167_p9 }
  0xbc   :  { %1177 = shalt.err (!%p1174_p0)  }
  0xbd   :  { %s1178_s19 = scalar_lea.vmem %s1660_s23, 16  ;;  %p1183_p1 = scmp.lt.s32.totalorder %s1660_s23, %s1574_s22 }
  0xbe   :  { %p1179_p5 = scmp.ne.s32.totalorder %s1660_s23, %s1178_s19  ;;  %p1184_p2 = scmp.lt.s32.totalorder %s1600_s14, %s1178_s19 }
  0xc0   :  { %p1185_p3 = por %p1184_p2, %p1183_p1 }
  0xc2   :  { %p1186_p4 = pnand %p1185_p3, %p1179_p5 }
  0xc4   :  { %1189 = shalt.err (!%p1186_p4)  }
  0xc5   :  { %173 = dma.hbm_to_vmem [thread:$0]  %s160_s17, 16, %s1660_s23, [#allocation3 + $0x5] }
  0xc6   :  { %s1959_s12 = smov (!%p773_p12, %s176_s12), 15  ;;  %s1504_s20 = smov [#allocation2 + $0x7]  }
  0xc7   :  { %s210_s21 = sshll.u32 %s1504_s20, 4  ;;  %s1706_s3 = sld [smem:[#allocation4 + $0x8]]  ;;  %s1708_s21 = int_to_ptr.vmem [resolvable:$true] %s210_s21 }
  0xc8   :  { %s778_s29 = sshll.u32 %s1959_s12, 4  ;;  %p195_p11 = scmp.gt.s32.totalorder %s1689_s0, 0 }
  0xc9   :  { %s180_s7 = scalar_lea.hbm %s1933_s2, %s778_s29 }
  0xca   :  { %s1190_s8 = scalar_lea.hbm %s180_s7, 16  ;;  %p1193_p7 = scmp.lt.u32.totalorder %s180_s7, %s1933_s2 }
  0xcb   :  { %p1191_p9 = scmp.ne.s32.totalorder %s180_s7, %s1190_s8  ;;  %p1194_p8 = scmp.lt.u32.totalorder %s1591_s11, %s1190_s8 }
  0xcc   :  { %p1196_p10 = scmp.lt.u32.totalorder %s1190_s8, %s180_s7 }
  0xcd   :  { %p1195_p12 = por %p1194_p8, %p1193_p7 }
  0xcf   :  { %p1197_p6 = por %p1196_p10, %p1195_p12 }
  0xd1   :  { %p1198_p13 = pnand %p1197_p6, %p1191_p9 }
  0xd3   :  { %1201 = shalt.err (!%p1198_p13)  }
  0xd4   :  { %s1202_s23 = scalar_lea.vmem %s1687_s30, 16  ;;  %p1207_p5 = scmp.lt.s32.totalorder %s1687_s30, %s1574_s22 }
  0xd5   :  { %p1203_p0 = scmp.ne.s32.totalorder %s1687_s30, %s1202_s23  ;;  %p1208_p1 = scmp.lt.s32.totalorder %s1600_s14, %s1202_s23 }
  0xd7   :  { %p1209_p2 = por %p1208_p1, %p1207_p5 }
  0xd9   :  { %p1210_p3 = pnand %p1209_p2, %p1203_p0 }
  0xdb   :  { %1213 = shalt.err (!%p1210_p3)  }
  0xdc   :  { %193 = dma.hbm_to_vmem [thread:$0]  %s180_s7, 16, %s1687_s30, [#allocation3 + $0x6] }
  0xdd   :  { %s196_s24 = scalar_select %p195_p11, %s1689_s0, 0 }
  0xde   :  { %p780_p4 = scmp.lt.s32.totalorder %s1689_s0, 15  ;;  %p215_p9 = scmp.gt.s32.totalorder %s1706_s3, 0 }
  0xdf   :  { %p787_p7 = scmp.lt.s32.totalorder %s1706_s3, 15  ;;  %s1505_s12 = smov [#allocation2 + $0x8]  }
  0xe0   :  { %s1961_s24 = smov (!%p780_p4, %s196_s24), 15  ;;  %s230_s13 = sshll.u32 %s1505_s12, 4  ;;  %s1734_s13 = int_to_ptr.vmem [resolvable:$true] %s230_s13 }
  0xe1   :  { %s216_s9 = scalar_select %p215_p9, %s1706_s3, 0 }
  0xe2   :  { %s785_s10 = sshll.u32 %s1961_s24, 4 }
  0xe3   :  { %s200_s17 = scalar_lea.hbm %s1933_s2, %s785_s10 }
  0xe4   :  { %s1214_s18 = scalar_lea.hbm %s200_s17, 16  ;;  %p1217_p11 = scmp.lt.u32.totalorder %s200_s17, %s1933_s2 }
  0xe5   :  { %p1215_p8 = scmp.ne.s32.totalorder %s200_s17, %s1214_s18  ;;  %p1218_p12 = scmp.lt.u32.totalorder %s1591_s11, %s1214_s18 }
  0xe6   :  { %p1220_p6 = scmp.lt.u32.totalorder %s1214_s18, %s200_s17 }
  0xe7   :  { %p1219_p10 = por %p1218_p12, %p1217_p11 }
  0xe9   :  { %p1221_p13 = por %p1220_p6, %p1219_p10 }
  0xeb   :  { %p1222_p0 = pnand %p1221_p13, %p1215_p8 }
  0xed   :  { %1225 = shalt.err (!%p1222_p0)  }
  0xee   :  { %s1226_s0 = scalar_lea.vmem %s1708_s21, 16  ;;  %p1231_p1 = scmp.lt.s32.totalorder %s1708_s21, %s1574_s22 }
  0xef   :  { %p1227_p5 = scmp.ne.s32.totalorder %s1708_s21, %s1226_s0  ;;  %p1232_p2 = scmp.lt.s32.totalorder %s1600_s14, %s1226_s0 }
  0xf1   :  { %p1233_p3 = por %p1232_p2, %p1231_p1 }
  0xf3   :  { %p1234_p4 = pnand %p1233_p3, %p1227_p5 }
  0xf5   :  { %1237 = shalt.err (!%p1234_p4)  }
  0xf6   :  { %213 = dma.hbm_to_vmem [thread:$0]  %s200_s17, 16, %s1708_s21, [#allocation3 + $0x7] }
  0xf7   :  { %s1963_s9 = smov (!%p787_p7, %s216_s9), 15  ;;  %s1748_s28 = sld [smem:[#allocation4 + $0x9]] }
  0xf8   :  { %s792_s19 = sshll.u32 %s1963_s9, 4  ;;  %s1506_s20 = smov [#allocation2 + $0x9]  }
  0xf9   :  { %s250_s29 = sshll.u32 %s1506_s20, 4  ;;  %s220_s7 = scalar_lea.hbm %s1933_s2, %s792_s19  ;;  %s1753_s29 = int_to_ptr.vmem [resolvable:$true] %s250_s29 }
  0xfa   :  { %s1238_s8 = scalar_lea.hbm %s220_s7, 16  ;;  %p1241_p8 = scmp.lt.u32.totalorder %s220_s7, %s1933_s2 }
  0xfb   :  { %p1239_p9 = scmp.ne.s32.totalorder %s220_s7, %s1238_s8  ;;  %p1242_p11 = scmp.lt.u32.totalorder %s1591_s11, %s1238_s8 }
  0xfc   :  { %p1244_p7 = scmp.lt.u32.totalorder %s1238_s8, %s220_s7 }
  0xfd   :  { %p1243_p12 = por %p1242_p11, %p1241_p8 }
  0xff   :  { %p1245_p10 = por %p1244_p7, %p1243_p12 }
 0x101   :  { %p1246_p6 = pnand %p1245_p10, %p1239_p9 }
 0x103   :  { %1249 = shalt.err (!%p1246_p6)  }
 0x104   :  { %s1250_s21 = scalar_lea.vmem %s1734_s13, 16  ;;  %p1255_p0 = scmp.lt.s32.totalorder %s1734_s13, %s1574_s22 }
 0x105   :  { %p1251_p13 = scmp.ne.s32.totalorder %s1734_s13, %s1250_s21  ;;  %p1256_p5 = scmp.lt.s32.totalorder %s1600_s14, %s1250_s21 }
 0x107   :  { %p1257_p1 = por %p1256_p5, %p1255_p0 }
 0x109   :  { %p1258_p2 = pnand %p1257_p1, %p1251_p13 }
 0x10b   :  { %1261 = shalt.err (!%p1258_p2)  }
 0x10c   :  { %233 = dma.hbm_to_vmem [thread:$0]  %s220_s7, 16, %s1734_s13, [#allocation3 + $0x8] }
 0x10d   :  { %s1765_s3 = sld [smem:[#allocation4 + $0xa]]  ;;  %s1507_s23 = smov [#allocation2 + $0xa]  }
 0x10e   :  { %s270_s24 = sshll.u32 %s1507_s23, 4  ;;  %s1767_s9 = sld [smem:[#allocation4 + $0xb]]  ;;  %s1771_s24 = int_to_ptr.vmem [resolvable:$true] %s270_s24 }
 0x10f   :  { %p235_p3 = scmp.gt.s32.totalorder %s1748_s28, 0  ;;  %p794_p4 = scmp.lt.s32.totalorder %s1748_s28, 15 }
 0x110   :  { %s1508_s10 = smov [#allocation2 + $0xb]   ;;  %s1776_s13 = sld [smem:[#allocation4 + $0xc]] }
 0x111   :  { %s1965_s28 = smov (!%p235_p3, %s1748_s28), 0  ;;  %s1774_s12 = sshll.u32 %s1508_s10, 4  ;;  %s1806_s12 = int_to_ptr.vmem [resolvable:$true] %s1774_s12 }
 0x112   :  { %s1967_s28 = smov (!%p794_p4, %s1965_s28), 15 }
 0x113   :  { %p255_p9 = scmp.gt.s32.totalorder %s1765_s3, 0  ;;  %s799_s15 = sshll.u32 %s1967_s28, 4 }
 0x114   :  { %p275_p11 = scmp.gt.s32.totalorder %s1767_s9, 0  ;;  %s240_s18 = scalar_lea.hbm %s1933_s2, %s799_s15 }
 0x115   :  { %s1262_s27 = scalar_lea.hbm %s240_s18, 16  ;;  %p1265_p10 = scmp.lt.u32.totalorder %s240_s18, %s1933_s2 }
 0x116   :  { %p1263_p7 = scmp.ne.s32.totalorder %s240_s18, %s1262_s27  ;;  %p1266_p6 = scmp.lt.u32.totalorder %s1591_s11, %s1262_s27 }
 0x117   :  { %p1268_p0 = scmp.lt.u32.totalorder %s1262_s27, %s240_s18 }
 0x118   :  { %p1267_p13 = por %p1266_p6, %p1265_p10 }
 0x11a   :  { %p1269_p5 = por %p1268_p0, %p1267_p13 }
 0x11c   :  { %p1270_p1 = pnand %p1269_p5, %p1263_p7 }
 0x11e   :  { %1273 = shalt.err (!%p1270_p1)  }
 0x11f   :  { %s1274_s28 = scalar_lea.vmem %s1753_s29, 16  ;;  %p1279_p3 = scmp.lt.s32.totalorder %s1753_s29, %s1574_s22 }
 0x120   :  { %p1275_p2 = scmp.ne.s32.totalorder %s1753_s29, %s1274_s28  ;;  %p1280_p4 = scmp.lt.s32.totalorder %s1600_s14, %s1274_s28 }
 0x122   :  { %p1281_p12 = por %p1280_p4, %p1279_p3 }
 0x124   :  { %p1282_p8 = pnand %p1281_p12, %p1275_p2 }
 0x126   :  { %1285 = shalt.err (!%p1282_p8)  }
 0x127   :  { %253 = dma.hbm_to_vmem [thread:$0]  %s240_s18, 16, %s1753_s29, [#allocation3 + $0x9] }
 0x128   :  { %s256_s19 = scalar_select %p255_p9, %s1765_s3, 0 }
 0x129   :  { %s276_s20 = scalar_select %p275_p11, %s1767_s9, 0 }
 0x12a   :  { %p1938_p7 = scmp.lt.s32.totalorder %s1765_s3, 15  ;;  %p1939_p10 = scmp.lt.s32.totalorder %s1767_s9, 15 }
 0x12c   :  { %s1969_s19 = smov (!%p1938_p7, %s256_s19), 15  ;;  %s1971_s20 = smov (!%p1939_p10, %s276_s20), 15 }
 0x12d   :  { %s806_s1 = sshll.u32 %s1969_s19, 4  ;;  %s813_s25 = sshll.u32 %s1971_s20, 4 }
 0x12e   :  { %s260_s8 = scalar_lea.hbm %s1933_s2, %s806_s1 }
 0x12f   :  { %s1286_s26 = scalar_lea.hbm %s260_s8, 16  ;;  %p1289_p9 = scmp.lt.u32.totalorder %s260_s8, %s1933_s2 }
 0x130   :  { %p1287_p8 = scmp.ne.s32.totalorder %s260_s8, %s1286_s26  ;;  %p1290_p12 = scmp.lt.u32.totalorder %s1591_s11, %s1286_s26 }
 0x131   :  { %p1292_p6 = scmp.lt.u32.totalorder %s1286_s26, %s260_s8 }
 0x132   :  { %p1291_p11 = por %p1290_p12, %p1289_p9 }
 0x134   :  { %p1293_p13 = por %p1292_p6, %p1291_p11 }
 0x136   :  { %p1294_p0 = pnand %p1293_p13, %p1287_p8 }
 0x138   :  { %1297 = shalt.err (!%p1294_p0)  }
 0x139   :  { %s1298_s3 = scalar_lea.vmem %s1771_s24, 16  ;;  %p1303_p1 = scmp.lt.s32.totalorder %s1771_s24, %s1574_s22 }
 0x13a   :  { %p1299_p5 = scmp.ne.s32.totalorder %s1771_s24, %s1298_s3  ;;  %p1304_p2 = scmp.lt.s32.totalorder %s1600_s14, %s1298_s3 }
 0x13c   :  { %p1305_p3 = por %p1304_p2, %p1303_p1 }
 0x13e   :  { %p1306_p4 = pnand %p1305_p3, %p1299_p5 }
 0x140   :  { %1309 = shalt.err (!%p1306_p4)  }
 0x141   :  { %273 = dma.hbm_to_vmem [thread:$0]  %s260_s8, 16, %s1771_s24, [#allocation3 + $0xa] }
 0x142   :  { %s280_s10 = scalar_lea.hbm %s1933_s2, %s813_s25  ;;  %p295_p7 = scmp.gt.s32.totalorder %s1776_s13, 0 }
 0x143   :  { %s1310_s15 = scalar_lea.hbm %s280_s10, 16  ;;  %p1313_p8 = scmp.lt.u32.totalorder %s280_s10, %s1933_s2 }
 0x144   :  { %p1311_p10 = scmp.ne.s32.totalorder %s280_s10, %s1310_s15  ;;  %p1314_p9 = scmp.lt.u32.totalorder %s1591_s11, %s1310_s15 }
 0x145   :  { %p1316_p11 = scmp.lt.u32.totalorder %s1310_s15, %s280_s10 }
 0x146   :  { %p1315_p12 = por %p1314_p9, %p1313_p8 }
 0x148   :  { %p1317_p6 = por %p1316_p11, %p1315_p12 }
 0x14a   :  { %p1318_p13 = pnand %p1317_p6, %p1311_p10 }
 0x14c   :  { %1321 = shalt.err (!%p1318_p13)  }
 0x14d   :  { %s1322_s24 = scalar_lea.vmem %s1806_s12, 16  ;;  %p1327_p5 = scmp.lt.s32.totalorder %s1806_s12, %s1574_s22 }
 0x14e   :  { %p1323_p0 = scmp.ne.s32.totalorder %s1806_s12, %s1322_s24  ;;  %p1328_p1 = scmp.lt.s32.totalorder %s1600_s14, %s1322_s24 }
 0x150   :  { %p1329_p2 = por %p1328_p1, %p1327_p5 }
 0x152   :  { %p1330_p3 = pnand %p1329_p2, %p1323_p0 }
 0x154   :  { %1333 = shalt.err (!%p1330_p3)  }
 0x155   :  { %293 = dma.hbm_to_vmem [thread:$0]  %s280_s10, 16, %s1806_s12, [#allocation3 + $0xb] }
 0x156   :  { %s296_s18 = scalar_select %p295_p7, %s1776_s13, 0 }
 0x157   :  { %p815_p4 = scmp.lt.s32.totalorder %s1776_s13, 15  ;;  %s1509_s27 = smov [#allocation2 + $0xc]  }
 0x158   :  { %s310_s30 = sshll.u32 %s1509_s27, 4  ;;  %s1839_s0 = sld [smem:[#allocation4 + $0xd]]  ;;  %s311_s30 = int_to_ptr.vmem [resolvable:$true] %s310_s30 }
 0x159   :  { %s1973_s18 = smov (!%p815_p4, %s296_s18), 15  ;;  %s1510_s6 = smov [#allocation2 + $0xd]  }
 0x15a   :  { %s820_s28 = sshll.u32 %s1973_s18, 4  ;;  %s330_s7 = sshll.u32 %s1510_s6, 4  ;;  %s331_s7 = int_to_ptr.vmem [resolvable:$true] %s330_s7 }
 0x15b   :  { %s300_s1 = scalar_lea.hbm %s1933_s2, %s820_s28 }
 0x15c   :  { %s1334_s8 = scalar_lea.hbm %s300_s1, 16  ;;  %p1337_p7 = scmp.lt.u32.totalorder %s300_s1, %s1933_s2 }
 0x15d   :  { %p1335_p10 = scmp.ne.s32.totalorder %s300_s1, %s1334_s8  ;;  %p1338_p8 = scmp.lt.u32.totalorder %s1591_s11, %s1334_s8 }
 0x15e   :  { %p1340_p12 = scmp.lt.u32.totalorder %s1334_s8, %s300_s1 }
 0x15f   :  { %p1339_p9 = por %p1338_p8, %p1337_p7 }
 0x161   :  { %p1341_p11 = por %p1340_p12, %p1339_p9 }
 0x163   :  { %p1342_p6 = pnand %p1341_p11, %p1335_p10 }
 0x165   :  { %1345 = shalt.err (!%p1342_p6)  }
 0x166   :  { %s1346_s13 = scalar_lea.vmem %s311_s30, 16  ;;  %p1351_p0 = scmp.lt.s32.totalorder %s311_s30, %s1574_s22 }
 0x167   :  { %p1347_p13 = scmp.ne.s32.totalorder %s311_s30, %s1346_s13  ;;  %p1352_p5 = scmp.lt.s32.totalorder %s1600_s14, %s1346_s13 }
 0x169   :  { %p1353_p1 = por %p1352_p5, %p1351_p0 }
 0x16b   :  { %p1354_p2 = pnand %p1353_p1, %p1347_p13 }
 0x16d   :  { %1357 = shalt.err (!%p1354_p2)  }
 0x16e   :  { %313 = dma.hbm_to_vmem [thread:$0]  %s300_s1, 16, %s311_s30, [#allocation3 + $0xc] }
 0x16f   :  { %p315_p3 = scmp.gt.s32.totalorder %s1839_s0, 0  ;;  %p822_p4 = scmp.lt.s32.totalorder %s1839_s0, 15 }
 0x170   :  { %s1852_s26 = sld [smem:[#allocation4 + $0xe]]  ;;  %s1511_s21 = smov [#allocation2 + $0xe]  }
 0x171   :  { %s1975_s0 = smov (!%p315_p3, %s1839_s0), 0  ;;  %s350_s29 = sshll.u32 %s1511_s21, 4  ;;  %s1857_s29 = int_to_ptr.vmem [resolvable:$true] %s350_s29 }
 0x172   :  { %s1855_s3 = sld [smem:[#allocation4 + $0xf]]  ;;  %s1977_s0 = smov (!%p822_p4, %s1975_s0), 15 }
 0x173   :  { %s827_s23 = sshll.u32 %s1977_s0, 4 }
 0x174   :  { %s320_s15 = scalar_lea.hbm %s1933_s2, %s827_s23 }
 0x175   :  { %s1358_s16 = scalar_lea.hbm %s320_s15, 16  ;;  %p1361_p8 = scmp.lt.u32.totalorder %s320_s15, %s1933_s2 }
 0x176   :  { %p335_p10 = scmp.gt.s32.totalorder %s1852_s26, 0  ;;  %p1359_p7 = scmp.ne.s32.totalorder %s320_s15, %s1358_s16 }
 0x177   :  { %p1362_p9 = scmp.lt.u32.totalorder %s1591_s11, %s1358_s16  ;;  %p1364_p11 = scmp.lt.u32.totalorder %s1358_s16, %s320_s15 }
 0x179   :  { %p1363_p12 = por %p1362_p9, %p1361_p8 }
 0x17b   :  { %p1365_p6 = por %p1364_p11, %p1363_p12 }
 0x17d   :  { %p1366_p13 = pnand %p1365_p6, %p1359_p7 }
 0x17f   :  { %1369 = shalt.err (!%p1366_p13)  }
 0x180   :  { %s1370_s18 = scalar_lea.vmem %s331_s7, 16  ;;  %p1375_p5 = scmp.lt.s32.totalorder %s331_s7, %s1574_s22 }
 0x181   :  { %p1371_p0 = scmp.ne.s32.totalorder %s331_s7, %s1370_s18  ;;  %p1376_p1 = scmp.lt.s32.totalorder %s1600_s14, %s1370_s18 }
 0x183   :  { %p1377_p2 = por %p1376_p1, %p1375_p5 }
 0x185   :  { %p1378_p3 = pnand %p1377_p2, %p1371_p0 }
 0x187   :  { %1381 = shalt.err (!%p1378_p3)  }
 0x188   :  { %333 = dma.hbm_to_vmem [thread:$0]  %s320_s15, 16, %s331_s7, [#allocation3 + $0xd] }
 0x189   :  { %s336_s27 = scalar_select %p335_p10, %s1852_s26, 0 }
 0x18a   :  { %p829_p4 = scmp.lt.s32.totalorder %s1852_s26, 15  ;;  %p355_p7 = scmp.gt.s32.totalorder %s1855_s3, 0 }
 0x18b   :  { %p836_p8 = scmp.lt.s32.totalorder %s1855_s3, 15  ;;  %s1512_s1 = smov [#allocation2 + $0xf]  }
 0x18c   :  { %s1979_s27 = smov (!%p829_p4, %s336_s27), 15  ;;  %s370_s6 = sshll.u32 %s1512_s1, 4  ;;  %s371_s6 = int_to_ptr.vmem [resolvable:$true] %s370_s6 }
 0x18d   :  { %s356_s30 = scalar_select %p355_p7, %s1855_s3, 0 }
 0x18e   :  { %s834_s0 = sshll.u32 %s1979_s27, 4 }
 0x18f   :  { %s340_s20 = scalar_lea.hbm %s1933_s2, %s834_s0 }
 0x190   :  { %s1382_s7 = scalar_lea.hbm %s340_s20, 16  ;;  %p1385_p12 = scmp.lt.u32.totalorder %s340_s20, %s1933_s2 }
 0x191   :  { %p1383_p9 = scmp.ne.s32.totalorder %s340_s20, %s1382_s7  ;;  %p1386_p11 = scmp.lt.u32.totalorder %s1591_s11, %s1382_s7 }
 0x192   :  { %p1388_p6 = scmp.lt.u32.totalorder %s1382_s7, %s340_s20 }
 0x193   :  { %p1387_p10 = por %p1386_p11, %p1385_p12 }
 0x195   :  { %p1389_p13 = por %p1388_p6, %p1387_p10 }
 0x197   :  { %p1390_p0 = pnand %p1389_p13, %p1383_p9 }
 0x199   :  { %1393 = shalt.err (!%p1390_p0)  }
 0x19a   :  { %s1394_s12 = scalar_lea.vmem %s1857_s29, 16  ;;  %p1399_p1 = scmp.lt.s32.totalorder %s1857_s29, %s1574_s22 }
 0x19b   :  { %p1395_p5 = scmp.ne.s32.totalorder %s1857_s29, %s1394_s12  ;;  %p1400_p2 = scmp.lt.s32.totalorder %s1600_s14, %s1394_s12 }
 0x19d   :  { %p1401_p3 = por %p1400_p2, %p1399_p1 }
 0x19f   :  { %p1402_p4 = pnand %p1401_p3, %p1395_p5 }
 0x1a1   :  { %1405 = shalt.err (!%p1402_p4)  }
 0x1a2   :  { %353 = dma.hbm_to_vmem [thread:$0]  %s340_s20, 16, %s1857_s29, [#allocation3 + $0xe] }
 0x1a3   :  { %s1981_s30 = smov (!%p836_p8, %s356_s30), 15 }
 0x1a4   :  { %s841_s13 = sshll.u32 %s1981_s30, 4 }
 0x1a5   :  { %s360_s23 = scalar_lea.hbm %s1933_s2, %s841_s13 }
 0x1a6   :  { %s1406_s9 = scalar_lea.hbm %s360_s23, 16  ;;  %p1409_p9 = scmp.lt.u32.totalorder %s360_s23, %s1933_s2 }
 0x1a7   :  { %p1407_p7 = scmp.ne.s32.totalorder %s360_s23, %s1406_s9  ;;  %p1410_p12 = scmp.lt.u32.totalorder %s1591_s11, %s1406_s9 }
 0x1a8   :  { %p1412_p10 = scmp.lt.u32.totalorder %s1406_s9, %s360_s23 }
 0x1a9   :  { %p1411_p11 = por %p1410_p12, %p1409_p9 }
 0x1ab   :  { %p1413_p6 = por %p1412_p10, %p1411_p11 }
 0x1ad   :  { %p1414_p13 = pnand %p1413_p6, %p1407_p7 }
 0x1af   :  { %1417 = shalt.err (!%p1414_p13)  }
 0x1b0   :  { %s1418_s29 = scalar_lea.vmem %s371_s6, 16  ;;  %p1423_p0 = scmp.lt.s32.totalorder %s371_s6, %s1574_s22 }
 0x1b1   :  { %p1419_p8 = scmp.ne.s32.totalorder %s371_s6, %s1418_s29  ;;  %p1424_p5 = scmp.lt.s32.totalorder %s1600_s14, %s1418_s29 }
 0x1b3   :  { %p1425_p1 = por %p1424_p5, %p1423_p0 }
 0x1b5   :  { %p1426_p2 = pnand %p1425_p1, %p1419_p8 }
 0x1b7   :  { %1429 = shalt.err (!%p1426_p2)  }
 0x1b8   :  { %373 = dma.hbm_to_vmem [thread:$0]  %s360_s23, 16, %s371_s6, [#allocation3 + $0xf] }
 0x1b9   :  { %1458 = dma.done.wait [#allocation3], 16 }
 0x1ba   :  { %1459 = vsyncadd [#allocation3], 4294967280 }
 0x1bb   :  { %1460 = dma.done.wait [#allocation3 + $0x1], 16 }
 0x1bc   :  { %1461 = vsyncadd [#allocation3 + $0x1], 4294967280 }
 0x1bd   :  { %1462 = dma.done.wait [#allocation3 + $0x2], 16 }
 0x1be   :  { %1463 = vsyncadd [#allocation3 + $0x2], 4294967280 }
 0x1bf   :  { %1464 = dma.done.wait [#allocation3 + $0x3], 16 }
 0x1c0   :  { %1465 = vsyncadd [#allocation3 + $0x3], 4294967280 }
 0x1c1   :  { %1466 = dma.done.wait [#allocation3 + $0x4], 16 }
 0x1c2   :  { %1467 = vsyncadd [#allocation3 + $0x4], 4294967280 }
 0x1c3   :  { %1468 = dma.done.wait [#allocation3 + $0x5], 16 }
 0x1c4   :  { %1469 = vsyncadd [#allocation3 + $0x5], 4294967280 }
 0x1c5   :  { %1470 = dma.done.wait [#allocation3 + $0x6], 16 }
 0x1c6   :  { %1471 = vsyncadd [#allocation3 + $0x6], 4294967280 }
 0x1c7   :  { %1472 = dma.done.wait [#allocation3 + $0x7], 16 }
 0x1c8   :  { %1473 = vsyncadd [#allocation3 + $0x7], 4294967280 }
 0x1c9   :  { %1474 = dma.done.wait [#allocation3 + $0x8], 16 }
 0x1ca   :  { %1475 = vsyncadd [#allocation3 + $0x8], 4294967280 }
 0x1cb   :  { %1476 = dma.done.wait [#allocation3 + $0x9], 16 }
 0x1cc   :  { %1477 = vsyncadd [#allocation3 + $0x9], 4294967280 }
 0x1cd   :  { %1478 = dma.done.wait [#allocation3 + $0xa], 16 }
 0x1ce   :  { %1479 = vsyncadd [#allocation3 + $0xa], 4294967280 }
 0x1cf   :  { %1480 = dma.done.wait [#allocation3 + $0xb], 16 }
 0x1d0   :  { %1481 = vsyncadd [#allocation3 + $0xb], 4294967280 }
 0x1d1   :  { %1482 = dma.done.wait [#allocation3 + $0xc], 16 }
 0x1d2   :  { %1483 = vsyncadd [#allocation3 + $0xc], 4294967280 }
 0x1d3   :  { %1484 = dma.done.wait [#allocation3 + $0xd], 16 }
 0x1d4   :  { %1485 = vsyncadd [#allocation3 + $0xd], 4294967280 }
 0x1d5   :  { %1486 = dma.done.wait [#allocation3 + $0xe], 16 }
 0x1d6   :  { %1487 = vsyncadd [#allocation3 + $0xe], 4294967280 }
 0x1d7   :  { %1488 = dma.done.wait [#allocation3 + $0xf], 16 }
 0x1d8   :  { %1489 = vsyncadd [#allocation3 + $0xf], 4294967280  ;;  %s1900_s2 = sld [smem:[#allocation9]]  ;;  %v1513_v0 = vmov 0.0|0.0   ;;  %vm1514_vm0 = vmmov 0   ;;  %v1515_v1 = vmov 0.0   ;;  %v410_v25 = vlaneseq }
 0x1d9   :  { %943 = vmatprep.subr.bf16.mxu0 %v1513_v0  ;;  %940 = vmatprep.mubr.msk.f32.mxu0 %vm1514_vm0, %v1515_v1  ;;  %v433_v2 = vld [vmem:[#allocation10] sm:$0xff]  ;;  %v434_v3 = vld [vmem:[#allocation10 + $0x8] sm:$0xff]  ;;  %v435_v4 = vld [vmem:[#allocation10 + $0x10] sm:$0xff]  ;;  %vm520_vm3 = vcmask 1040384   ;;  %s842_s17 = sld [smem:[#allocation9 + $0x1]]  ;;  %s1516_s18 = smov [#allocation11]  }
 0x1da   :  { %v944_v5 = vpack.c.bf16 %v434_v3, %v433_v2  ;;  %v436_v6 = vld [vmem:[#allocation10 + $0x18] sm:$0xff]  ;;  %v437_v8 = vld [vmem:[#allocation10 + $0x20] sm:$0xff]  ;;  %v438_v9 = vld [vmem:[#allocation10 + $0x28] sm:$0xff]  ;;  %v1904_v28 = vshrl.u32 %v410_v25, 7  ;;  %v536_v57 = vand.u32 127, %v410_v25  ;;  %s577_s27 = sshll.u32 %s1516_s18, 4  ;;  %s578_s27 = int_to_ptr.vmem [resolvable:$true] %s577_s27 }
 0x1db   :  { %v947_v7 = vpack.c.bf16 %v436_v6, %v435_v4  ;;  %v950_v11 = vpack.c.bf16 %v438_v9, %v437_v8  ;;  %v439_v12 = vld [vmem:[#allocation10 + $0x30] sm:$0xff]  ;;  %v440_v13 = vld [vmem:[#allocation10 + $0x38] sm:$0xff]  ;;  %v441_v15 = vld [vmem:[#allocation10 + $0x40] sm:$0xff]  ;;  %s1430_s30 = scalar_lea.vmem %s578_s27, 128  ;;  %p1435_p9 = scmp.lt.s32.totalorder %s578_s27, %s578_s27 }
 0x1dc   :  { %945 = vmatpush3.bf16.msra.mxu0 %v944_v5  ;;  %v953_v14 = vpack.c.bf16 %v440_v13, %v439_v12  ;;  %v442_v16 = vld [vmem:[#allocation10 + $0x48] sm:$0xff]  ;;  %v443_v18 = vld [vmem:[#allocation10 + $0x50] sm:$0xff]  ;;  %v444_v19 = vld [vmem:[#allocation10 + $0x58] sm:$0xff]  ;;  %v412_v30 = vadd.s32 8, %v1904_v28  ;;  %vm561_vm5 = vcmp.eq.s32.totalorder %v536_v57, 0  ;;  %vm566_vm6 = vcmp.eq.s32.totalorder %v1904_v28, 2  ;;  %p1431_p7 = scmp.ne.s32.totalorder %s578_s27, %s1430_s30  ;;  %p1436_p12 = scmp.lt.s32.totalorder %s1430_s30, %s1430_s30 }
 0x1dd   :  { %946 = vmatprep.subr.bf16.mxu0 %v1513_v0  ;;  %v956_v17 = vpack.c.bf16 %v442_v16, %v441_v15  ;;  %v959_v21 = vpack.c.bf16 %v444_v19, %v443_v18  ;;  %v445_v22 = vld [vmem:[#allocation10 + $0x60] sm:$0xff]  ;;  %v446_v23 = vld [vmem:[#allocation10 + $0x68] sm:$0xff]  ;;  %v447_v26 = vld [vmem:[#allocation10 + $0x70] sm:$0xff]  ;;  %vm565_vm7 = vcmp.eq.s32.totalorder %v1904_v28, 1  ;;  %vm564_vm8 = vcmp.eq.s32.totalorder %v1904_v28, 0 }
 0x1de   :  { %p425_p3 = scmp.gt.s32.totalorder %s1900_s2, 1  ;;  %v962_v24 = vpack.c.bf16 %v446_v23, %v445_v22  ;;  %v448_v27 = vld [vmem:[#allocation10 + $0x78] sm:$0xff]  ;;  %v413_v31 = vstv %s1900_s2  ;;  %v408_v32 = vld [vmem:[#allocation2] sm:$0xff]  ;;  %p1437_p11 = por %p1436_p12, %p1435_p9 }
 0x1df   :  { %v965_v29 = vpack.c.bf16 %v448_v27, %v447_v26  ;;  %v409_v33 = vld [vmem:[#allocation2 + $0x8] sm:$0xff]  ;;  %vm414_vm1 = vcmp.lt.s32.totalorder %v1904_v28, %v413_v31  ;;  %vm415_vm2 = vcmp.lt.s32.totalorder %v412_v30, %v413_v31  ;;  %v449_v45 = vld [vmem:[%s1935_s4] sm:$0x1]  ;;  %v537_v59 = vstv %s842_s17  ;;  %p550_p4 = scmp.ge.s32.totalorder %s842_s17, 0 }
 0x1e0   :  { %s426_s22 = scalar_select %p425_p3, %s1900_s2, 1  ;;  %948 = vmatpush3.bf16.msra.mxu0 %v947_v7  ;;  %v416_v34 = vsel %vm414_vm1, %v408_v32, 0.0  ;;  %v417_v35 = vsel %vm415_vm2, %v409_v33, 0.0  ;;  %vm538_vm4 = vcmp.eq.s32.totalorder %v536_v57, %v537_v59  ;;  %v555_v7 = vsub.s32 0, %v1904_v28 }
 0x1e1   :  { %949 = vmatprep.subr.bf16.mxu0 %v1513_v0  ;;  %v418_v36 = vadd.f32 %v417_v35, %v416_v34  ;;  %p1438_p10 = pnand %p1437_p11, %p1431_p7 }
 0x1e2   :  { %s427_s11 = scvt.s32.f32 %s426_s22 }
 0x1e3   :  { %v419_v37 = vrot.slane %v418_v36, 4 }
 0x1e4   :  { %v428_v10 = vstv %s427_s11  ;;  %951 = vmatpush3.bf16.msra.mxu0 %v950_v11 }
 0x1e5   :  { %996 = vrcp.f32 %v428_v10  ;;  %952 = vmatprep.subr.bf16.mxu0 %v1513_v0  ;;  %v420_v38 = vadd.f32 %v419_v37, %v418_v36 }
 0x1e7   :  { %v421_v39 = vrot.slane %v420_v38, 2 }
 0x1e8   :  { %954 = vmatpush3.bf16.msra.mxu0 %v953_v14 }
 0x1e9   :  { %955 = vmatprep.subr.bf16.mxu0 %v1513_v0  ;;  %v422_v40 = vadd.f32 %v421_v39, %v420_v38 }
 0x1eb   :  { %v423_v41 = vrot.slane %v422_v40, 1 }
 0x1ec   :  { %957 = vmatpush3.bf16.msra.mxu0 %v956_v17 }
 0x1ed   :  { %958 = vmatprep.subr.bf16.mxu0 %v1513_v0  ;;  %v424_v42 = vadd.f32 %v423_v41, %v422_v40 }
 0x1ef   :  { %v997_v20 = vpop.eup %996 }
 0x1f0   :  { %967 = vpush %v997_v20  ;;  %960 = vmatpush3.bf16.msra.mxu0 %v959_v21 }
 0x1f1   :  { %961 = vmatprep.subr.bf16.mxu0 %v1513_v0 }
 0x1f4   :  { %963 = vmatpush3.bf16.msra.mxu0 %v962_v24 }
 0x1f5   :  { %964 = vmatprep.subr.bf16.mxu0 %v1513_v0 }
 0x1f8   :  { %966 = vmatpush3.bf16.msra.mxu0 %v965_v29 }
 0x221   :  { %s968_s14 = spop %967 }
 0x222   :  { %v431_v43 = vstv %s968_s14 }
 0x223   :  { %v432_v44 = vmul.f32 %v431_v43, %v424_v42 }
 0x225   :  { %941 = vmatmul.mubr.f32.vlgmr.msra.gmra.mrb[0].mxu0 %v432_v44 }
 0x2f8   :  { %v516_v46 = vpop.f32.mrb[0].mxu0 }
 0x2f9   :  { %v517_v47 = vadd.f32 %v516_v46, %v449_v45  ;;  %v942_v48 = vpop.f32.mrb[1].mxu0 }
 0x2fb   :  { %v521_v49 = vsel %vm520_vm3, %v517_v47, -inf  ;;  %v556_v12 = vrot.slane %v517_v47, %v555_v7 }
 0x2fc   :  { %522 = vmax.xlane.f32.xlu0 %v521_v49 }
 0x389   :  { %v523_v50 = vpop.xlane.xlu0 %522 }
 0x38a   :  { %v524_v51 = vsub.f32 %v517_v47, %v523_v50 }
 0x38c   :  { %v525_v52 = vmul.f32 1.442695, %v524_v51 }
 0x38e   :  { %998 = vpow2.f32 %v525_v52 }
 0x398   :  { %v999_v53 = vpop.eup %998 }
 0x399   :  { %v527_v54 = vsel %vm520_vm3, %v999_v53, 0.0 }
 0x39a   :  { %528 = vadd.xlane.f32.xlu0 %v527_v54 }
 0x427   :  { %v529_v55 = vpop.xlane.xlu0 %528 }
 0x428   :  { %1000 = vlog2.f32 %v529_v55 }
 0x432   :  { %v1001_v56 = vpop.eup %1000 }
 0x433   :  { %v531_v58 = vmul.f32 0.6931472, %v1001_v56 }
 0x435   :  { %v532_v60 = vadd.f32 %v531_v58, %v523_v50 }
 0x437   :  { %v533_v61 = vsub.f32 %v517_v47, %v532_v60 }
 0x439   :  { %v539_v62 = vsel %vm538_vm4, %v533_v61, 0.0  ;;  %v560_v9 = vrot.slane %v533_v61, %v555_v7 }
 0x43a   :  { %v540_v63 = vsel %vm520_vm3, %v539_v62, 0.0 }
 0x43b   :  { %541 = vadd.xlane.f32.xlu1 %v540_v63 }
 0x4c8   :  { %v542_v0 = vpop.xlane.xlu1 %541 }
 0x4c9   :  { %v543_v1 = vrot.slane %v542_v0, 4 }
 0x4cb   :  { %v544_v2 = vadd.f32 %v543_v1, %v542_v0 }
 0x4cd   :  { %v545_v3 = vrot.slane %v544_v2, 2 }
 0x4cf   :  { %v546_v4 = vadd.f32 %v545_v3, %v544_v2 }
 0x4d1   :  { %v547_v5 = vrot.slane %v546_v4, 1 }
 0x4d3   :  { %v548_v6 = vadd.f32 %v547_v5, %v546_v4 }
 0x4d5   :  { %969 = vpush %v548_v6 }
 0x506   :  { %s970_s4 = spop %969 }
 0x507   :  { %s551_s24 = ssub.f32 0.0, %s970_s4 }
 0x509   :  { %s1983_s24 = smov (!%p550_p4, %s551_s24), 0.0 }
 0x50a   :  { %v562_v8 = vstv %s1983_s24 }
 0x50b   :  { %v563_v10 = vsel %vm561_vm5, %v562_v8, 0.0 }
 0x50c   :  { %v567_v11 = vsel %vm566_vm6, %v563_v10, 0.0 }
 0x50d   :  { %v568_v13 = vsel %vm565_vm7, %v560_v9, %v567_v11 }
 0x50e   :  { %v569_v14 = vsel %vm564_vm8, %v556_v12, %v568_v13 }
 0x50f   :  { %570 = vst [vmem:[#allocation11] sm:$0xff] %v569_v14 }
 0x510   :  { %1441 = shalt.err (!%p1438_p10)
}
 0x511   :  { %s1442_s19 = scalar_lea.hbm %s1936_s5, 128 }
 0x512   :  { %p1443_p6 = scmp.ne.s32.totalorder %s1936_s5, %s1442_s19  ;;  %p1446_p13 = scmp.lt.u32.totalorder %s1442_s19, %s1936_s5 }
 0x514   :  { %p1448_p8 = pnand %p1446_p13, %p1443_p6 }
 0x516   :  { %1451 = shalt.err (!%p1448_p8)
}
 0x517   :  { %580 = dma.vmem_to_hbm [thread:$0]  %s578_s27, 128, %s1936_s5, [#allocation6]  }
 0x518   :  { %1490 = dma.done.wait [#allocation6], 128  }
 0x519   :  { %1491 = vsyncadd [#allocation6], 4294967168 }
 0x51a   :  { %584 = vsyncpa [#allocation5], 1 }
 0x51b   :  { %585 = vsyncpa [#allocation6], 1 }
 0x51c   :  { %586 = vsyncpa [#allocation7], 1 }
 0x51d   :  { %587 = vsyncpa [#allocation8], 1 }
 0x51e   :  { %588 = vsyncmov [#allocation3] }
 0x521   :  { %s589_s12 = vpop.sfrf %588 }
 0x522   :  { %p843_p0 = scmp.ne.s32.totalorder %s589_s12, 0 }
 0x524   :  { %593 = shalt.err (%p843_p0)  }
 0x525   :  { %595 = vsyncmov [#allocation3 + $0x1] }
 0x528   :  { %s596_s13 = vpop.sfrf %595 }
 0x529   :  { %p844_p5 = scmp.ne.s32.totalorder %s596_s13, 0 }
 0x52b   :  { %600 = shalt.err (%p844_p5)  }
 0x52c   :  { %602 = vsyncmov [#allocation3 + $0x2] }
 0x52f   :  { %s603_s26 = vpop.sfrf %602 }
 0x530   :  { %p845_p1 = scmp.ne.s32.totalorder %s603_s26, 0 }
 0x532   :  { %607 = shalt.err (%p845_p1)  }
 0x533   :  { %609 = vsyncmov [#allocation3 + $0x3] }
 0x536   :  { %s610_s5 = vpop.sfrf %609 }
 0x537   :  { %p846_p2 = scmp.ne.s32.totalorder %s610_s5, 0 }
 0x539   :  { %614 = shalt.err (%p846_p2)  }
 0x53a   :  { %616 = vsyncmov [#allocation3 + $0x4] }
 0x53d   :  { %s617_s21 = vpop.sfrf %616 }
 0x53e   :  { %p847_p3 = scmp.ne.s32.totalorder %s617_s21, 0 }
 0x540   :  { %621 = shalt.err (%p847_p3)  }
 0x541   :  { %623 = vsyncmov [#allocation3 + $0x5] }
 0x544   :  { %s624_s23 = vpop.sfrf %623 }
 0x545   :  { %p848_p4 = scmp.ne.s32.totalorder %s624_s23, 0 }
 0x547   :  { %628 = shalt.err (%p848_p4)  }
 0x548   :  { %630 = vsyncmov [#allocation3 + $0x6] }
 0x54b   :  { %s631_s9 = vpop.sfrf %630 }
 0x54c   :  { %p849_p7 = scmp.ne.s32.totalorder %s631_s9, 0 }
 0x54e   :  { %635 = shalt.err (%p849_p7)  }
 0x54f   :  { %637 = vsyncmov [#allocation3 + $0x7] }
 0x552   :  { %s638_s10 = vpop.sfrf %637 }
 0x553   :  { %p850_p9 = scmp.ne.s32.totalorder %s638_s10, 0 }
 0x555   :  { %642 = shalt.err (%p850_p9)  }
 0x556   :  { %644 = vsyncmov [#allocation3 + $0x8] }
 0x559   :  { %s645_s15 = vpop.sfrf %644 }
 0x55a   :  { %p851_p12 = scmp.ne.s32.totalorder %s645_s15, 0 }
 0x55c   :  { %649 = shalt.err (%p851_p12)  }
 0x55d   :  { %651 = vsyncmov [#allocation3 + $0x9] }
 0x560   :  { %s652_s29 = vpop.sfrf %651 }
 0x561   :  { %p852_p11 = scmp.ne.s32.totalorder %s652_s29, 0 }
 0x563   :  { %656 = shalt.err (%p852_p11)  }
 0x564   :  { %658 = vsyncmov [#allocation3 + $0xa] }
 0x567   :  { %s659_s2 = vpop.sfrf %658 }
 0x568   :  { %p853_p10 = scmp.ne.s32.totalorder %s659_s2, 0 }
 0x56a   :  { %663 = shalt.err (%p853_p10)  }
 0x56b   :  { %665 = vsyncmov [#allocation3 + $0xb] }
 0x56e   :  { %s666_s22 = vpop.sfrf %665 }
 0x56f   :  { %p854_p6 = scmp.ne.s32.totalorder %s666_s22, 0 }
 0x571   :  { %670 = shalt.err (%p854_p6)  }
 0x572   :  { %672 = vsyncmov [#allocation3 + $0xc] }
 0x575   :  { %s673_s11 = vpop.sfrf %672 }
 0x576   :  { %p855_p13 = scmp.ne.s32.totalorder %s673_s11, 0 }
 0x578   :  { %677 = shalt.err (%p855_p13)  }
 0x579   :  { %679 = vsyncmov [#allocation3 + $0xd] }
 0x57c   :  { %s680_s14 = vpop.sfrf %679 }
 0x57d   :  { %p856_p8 = scmp.ne.s32.totalorder %s680_s14, 0 }
 0x57f   :  { %684 = shalt.err (%p856_p8)  }
 0x580   :  { %686 = vsyncmov [#allocation3 + $0xe] }
 0x583   :  { %s687_s3 = vpop.sfrf %686 }
 0x584   :  { %p857_p0 = scmp.ne.s32.totalorder %s687_s3, 0 }
 0x586   :  { %691 = shalt.err (%p857_p0)  }
 0x587   :  { %693 = vsyncmov [#allocation3 + $0xf] }
 0x58a   :  { %s694_s16 = vpop.sfrf %693 }
 0x58b   :  { %p858_p5 = scmp.ne.s32.totalorder %s694_s16, 0 }
 0x58d   :  { %698 = shalt.err (%p858_p5)  }

</bundles_post_ra>
